<compile_context>
chip_gen: v5e
topology: v5e:2x2
jax: 0.10.0
libtpu: 0.0.40
codegen_flags: <defaults>
</compile_context>

<pallas_src>
import jax
import jax.numpy as jnp
import numpy as np
from jax.experimental import pallas as pl
from jax.experimental.pallas import tpu as pltpu

HIGHEST = jax.lax.Precision.HIGHEST          # only used by the pure-JAX references


def _pick_row_tile(Hd, Wd):
    """Smallest divisor th of Hd with th*Wd a multiple of 128 (lane-dense blocks);
    falls back to the full extent (block == full dim is always a legal BlockSpec)."""
    for th in range(1, Hd + 1):
        if Hd % th == 0 and (th * Wd) % 128 == 0:
            return th
    return Hd


# --------------------------------------------------------------------------------------
# Offset-generating conv: Conv2d(C_in -> 2*kh*kw, kernel 3x3, stride 1, pad 1, bias).
# im2col is built *inside* the kernel from a (th+2)-row window of the padded image
# (no HBM patches array); one MXU matmul per tile; output is written channel-major
# (OC on sublanes, pixels on 128-wide lanes) so stores are lane-dense and the result is
# already in the layout the deform stage wants.
# --------------------------------------------------------------------------------------
def _make_offset_kernel(W, C, th):
    def kernel(x_ref, w_ref, b_ref, o_ref):
        # x_ref: (1, H+2, W+2, C); w_ref: (OC, 9C); b_ref: (OC, 1); o_ref: (1, OC, th*W)
        t = pl.program_id(1)
        align = th & -th
        r0 = pl.multiple_of(t * th, align)
        xw = x_ref[0, pl.ds(r0, th + 2), :, :]                       # (th+2, W+2, C)

        taps = []
        for i in range(3):
            for j in range(3):
                # (th*W, C) tap built row-by-row with plain 2-D slices + sublane concat
                rows = [xw[i + r, j:j + W, :] for r in range(th)]
                taps.append(jnp.concatenate(rows, axis=0))
        patches = jnp.concatenate(taps, axis=1)                      # (th*W, 9C), col = k*C + c

        # (OC, th*W) = W2 @ patches^T   (contract the shared 9C axis; default MXU precision)
        out_t = jax.lax.dot_general(
            w_ref[...], patches, (((1,), (1,)), ((), ())),
            preferred_element_type=jnp.float32)
        o_ref[0] = out_t + b_ref[...]

    return kernel


def offset_conv2d(x, w_off, b_off):
    """x: (B, C, H, W) NCHW.  Returns offsets channel-major: (B, 2*kh*kw, H*W)."""
    B, C, H, W = x.shape
    OC = w_off.shape[0]                                              # 2 * kh * kw
    th = _pick_row_tile(H, W)
    T = th * W

    # channels-last, zero padding of 1 (the conv's own padding)
    xp = jnp.pad(x, ((0, 0), (0, 0), (1, 1), (1, 1))).transpose(0, 2, 3, 1)  # (B,H+2,W+2,C)
    w2 = w_off.transpose(0, 2, 3, 1).reshape(OC, 9 * C)              # col = (i*3+j)*C + c
    b2 = b_off.reshape(OC, 1)

    return pl.pallas_call(
        _make_offset_kernel(W, C, th),
        out_shape=jax.ShapeDtypeStruct((B, OC, H * W), jnp.float32),
        grid=(B, H // th),
        in_specs=[
            pl.BlockSpec((1, H + 2, W + 2, C), lambda b, t: (b, 0, 0, 0)),
            pl.BlockSpec((OC, 9 * C), lambda b, t: (0, 0)),
            pl.BlockSpec((OC, 1), lambda b, t: (0, 0)),
        ],
        out_specs=pl.BlockSpec((1, OC, T), lambda b, t: (b, 0, t)),
        compiler_params=pltpu.CompilerParams(
            dimension_semantics=("parallel", "arbitrary")),
    )(xp, w2, b2)


# --------------------------------------------------------------------------------------
# Deformable conv kernel.  Grid = (batch, output-row tiles).  For each kernel tap a single
# one-hot sampling matrix is built from the base bilinear corner on a ZERO-PADDED image;
# the other three corners come from pltpu.roll (XLU) of the weighted one-hot, with the
# per-corner validity folded into four (T, 1) separable weights.  The gather is one MXU
# matmul per tap, and the 9 sampled taps are contracted against the full deform weight
# with a single K = kh*kw*C_in matmul, written channel-major (lane-dense, NCHW-flat).
# --------------------------------------------------------------------------------------
def _make_deform_kernel(H, W, Ho, Wo, C_in, C_out, kh, kw, stride, pad, dil, th):
    Hp, Wp = H + 2, W + 2
    HWp = Hp * Wp
    T = th * Wo

    def kernel(x_ref, off_ref, w_ref, o_ref):
        # x_ref: (1, HWp, C_in) zero-padded image; off_ref: (1, T, 2*kh*kw);
        # w_ref: (C_out, kh*kw*C_in); o_ref: (1, C_out, T)
        x = x_ref[0]                                                 # (HWp, C_in)
        off = off_ref[0]                                             # (T, 2*kh*kw)
        t = pl.program_id(1)

        pix = t * T + jax.lax.broadcasted_iota(jnp.int32, (T, 1), 0)
        # TODO(synk): the per-pixel address math still runs on (T, 1) columns; making it
        # fully lane-dense would need an in-kernel transpose before the one-hot broadcast.
        oy = (pix // Wo).astype(jnp.float32) * float(stride)
        ox = (pix % Wo).astype(jnp.float32) * float(stride)
        q = jax.lax.broadcasted_iota(jnp.int32, (T, HWp), 1)         # flattened padded index

        cols = []
        for i in range(kh):
            for j in range(kw):
                k = i * kw + j
                # sampling position in PADDED image coordinates (+1 border turns
                # torchvision's "zero outside the image" rule into plain zero reads)
                ph = oy + float(i * dil - pad + 1) + off[:, 2 * k:2 * k + 1]
                pw = ox + float(j * dil - pad + 1) + off[:, 2 * k + 1:2 * k + 2]
                h0 = jnp.floor(ph)
                w0 = jnp.floor(pw)
                lh = ph - h0
                lw = pw - w0
                # per-corner validity folded into four separable (T, 1) weights
                wy0 = jnp.where((h0 >= 0.0) & (h0 <= Hp - 1.0), 1.0 - lh, 0.0)
                wy1 = jnp.where((h0 >= -1.0) & (h0 <= Hp - 2.0), lh, 0.0)
                wx0 = jnp.where((w0 >= 0.0) & (w0 <= Wp - 1.0), 1.0 - lw, 0.0)
                wx1 = jnp.where((w0 >= -1.0) & (w0 <= Wp - 2.0), lw, 0.0)

                lin = h0.astype(jnp.int32) * Wp + w0.astype(jnp.int32)   # (T, 1)
                eq = q == lin                                            # (T, HWp)
                # one one-hot per tap; the other three corners come from XLU rolls
                a0 = jnp.where(eq, wy0, 0.0)
                a1 = jnp.where(eq, wy1, 0.0)
                rowc = a0 + pltpu.roll(a1, Wp, axis=1)                   # +1 padded row
                m = wx0 * rowc + wx1 * pltpu.roll(rowc, 1, axis=1)       # +1 padded col
                cols.append(jnp.dot(m, x, preferred_element_type=jnp.float32))   # (T, C_in)

        cols_all = jnp.concatenate(cols, axis=1)                     # (T, kh*kw*C_in)
        # single big-K matmul against the full deform weight, written channel-major
        o_ref[0] = jax.lax.dot_general(
            w_ref[...], cols_all, (((1,), (1,)), ((), ())),
            preferred_element_type=jnp.float32)                      # (C_out, T)

    return kernel


def deform_conv2d(x, offsets_cm, w_d, *, stride=1, pad=1, dil=1):
    """x: (B, C_in, H, W); offsets_cm: (B, 2*kh*kw, Ho*Wo) channel-major, torchvision
    (y, x)-interleaved order; w_d: (C_out, C_in, kh, kw).  Returns (B, C_out, Ho, Wo)."""
    B, C_in, H, W = x.shape
    C_out, _, kh, kw = w_d.shape
    Ho = (H + 2 * pad - dil * (kh - 1) - 1) // stride + 1
    Wo = (W + 2 * pad - dil * (kw - 1) - 1) // stride + 1
    th = _pick_row_tile(Ho, Wo)
    T = th * Wo
    Hp, Wp = H + 2, W + 2

    # zero-padded (+/-1) image, channels-last, spatially flattened: the zero border
    # implements torchvision's zero-outside-the-image bilinear rule with no clip masks.
    xpad = (jnp.pad(x, ((0, 0), (0, 0), (1, 1), (1, 1)))
            .transpose(0, 2, 3, 1).reshape(B, Hp * Wp, C_in))
    # the kernel's per-pixel address math wants pixel-major offsets
    off_pm = jnp.swapaxes(offsets_cm, 1, 2)                          # (B, Ho*Wo, 2*kh*kw)
    w2 = w_d.transpose(0, 2, 3, 1).reshape(C_out, kh * kw * C_in)    # col = (i*kw+j)*C_in + c

    # TODO(synk): for very large feature maps (v7x's 64 MiB VMEM) also window the HW_in
    # axis of the gather instead of keeping the whole padded image per batch in VMEM.
    out = pl.pallas_call(
        _make_deform_kernel(H, W, Ho, Wo, C_in, C_out, kh, kw, stride, pad, dil, th),
        out_shape=jax.ShapeDtypeStruct((B, C_out, Ho * Wo), jnp.float32),
        grid=(B, Ho // th),
        in_specs=[
            pl.BlockSpec((1, Hp * Wp, C_in), lambda b, t: (b, 0, 0)),
            pl.BlockSpec((1, T, 2 * kh * kw), lambda b, t: (b, t, 0)),
            pl.BlockSpec((C_out, kh * kw * C_in), lambda b, t: (0, 0)),
        ],
        out_specs=pl.BlockSpec((1, C_out, T), lambda b, t: (b, 0, t)),
        compiler_params=pltpu.CompilerParams(
            dimension_semantics=("parallel", "arbitrary")),
    )(xpad, off_pm, w2)
    return out.reshape(B, C_out, Ho, Wo)


def basic_deform_conv2d(x, params, *, stride=1, dilation=1):
    """Forward pass of BasicDeformConv2d (kernel_size=3): offset conv then deform conv."""
    off_cm = offset_conv2d(x, params["w_off"], params["b_off"])      # (B, 2*k*k, H*W)
    return deform_conv2d(x, off_cm, params["w_deform"],
                         stride=stride, pad=dilation, dil=dilation)


# --------------------------------------------------------------------------------------
# Pure-JAX reference (torchvision deform_conv2d semantics) for correctness checking.
# --------------------------------------------------------------------------------------
def _bilinear_ref(x, ph, pw):
    B, C, H, W = x.shape
    h0 = jnp.floor(ph)
    w0 = jnp.floor(pw)
    lh = ph - h0
    lw = pw - w0
    valid_p = (ph > -1) & (ph < H) & (pw > -1) & (pw < W)
    out = jnp.zeros((B, C) + ph.shape[1:], jnp.float32)
    for dy in (0, 1):
        for dx in (0, 1):
            hc = h0 + dy
            wc = w0 + dx
            wy = lh if dy == 1 else 1.0 - lh
            wx = lw if dx == 1 else 1.0 - lw
            valid = valid_p & (hc >= 0) & (hc <= H - 1) & (wc >= 0) & (wc <= W - 1)
            hi = jnp.clip(hc, 0, H - 1).astype(jnp.int32)
            wi = jnp.clip(wc, 0, W - 1).astype(jnp.int32)
            g = jax.vmap(lambda xb, hb, wb: xb[:, hb, wb])(x, hi, wi)   # (B, C, Ho, Wo)
            out = out + jnp.where(valid, wy * wx, 0.0)[:, None] * g
    return out


def deform_conv2d_ref(x, offset, w_d, *, stride=1, pad=1, dil=1):
    B, C, H, W = x.shape
    C_out, _, kh, kw = w_d.shape
    Ho = (H + 2 * pad - dil * (kh - 1) - 1) // stride + 1
    Wo = (W + 2 * pad - dil * (kw - 1) - 1) // stride + 1
    oh = jnp.arange(Ho, dtype=jnp.float32)[:, None]
    ow = jnp.arange(Wo, dtype=jnp.float32)[None, :]
    out = jnp.zeros((B, C_out, Ho, Wo), jnp.float32)
    for i in range(kh):
        for j in range(kw):
            k = i * kw + j
            ph = oh * stride - pad + i * dil + offset[:, 2 * k]
            pw = ow * stride - pad + j * dil + offset[:, 2 * k + 1]
            val = _bilinear_ref(x, ph, pw)
            out = out + jnp.einsum('oc,bchw->bohw', w_d[:, :, i, j], val,
                                   precision=HIGHEST)
    return out


if __name__ == "__main__":
    key = jax.random.PRNGKey(0)
    k1, k2, k3, k4 = jax.random.split(key, 4)

    B, C_in, H, W = 2, 4, 16, 16
    C_out, ksz = 8, 3                      # kernel_size=3 (see note at top)
    x = jax.random.normal(k1, (B, C_in, H, W), jnp.float32)
    params = {
        # conv2d_offset: Conv2d(C_in, 2*k*k, kernel 3, stride 1, pad 1) with bias
        "w_off": 0.1 * jax.random.normal(k2, (2 * ksz * ksz, C_in, 3, 3), jnp.float32),
        "b_off": 0.1 * jax.random.normal(k3, (2 * ksz * ksz,), jnp.float32),
        # DeformConv2d weight: (C_out, C_in, k, k), bias=False
        "w_deform": jax.random.normal(k4, (C_out, C_in, ksz, ksz), jnp.float32)
                    / np.sqrt(C_in * ksz * ksz),
    }

    out = basic_deform_conv2d(x, params)
    out = jax.block_until_ready(out)
    assert out.shape == (B, C_out, H, W), out.shape

    # Cross-check the offset conv against lax.conv_general_dilated.
    off_cm = offset_conv2d(x, params["w_off"], params["b_off"])      # (B, 18, H*W)
    off_nchw = off_cm.reshape(B, 2 * ksz * ksz, H, W)
    off_ref = jax.lax.conv_general_dilated(
        x, params["w_off"], window_strides=(1, 1), padding=((1, 1), (1, 1)),
        dimension_numbers=("NCHW", "OIHW", "NCHW"), precision=HIGHEST
    ) + params["b_off"][None, :, None, None]
    np.testing.assert_allclose(np.asarray(off_nchw), np.asarray(off_ref),
                               rtol=2e-2, atol=2e-2)

    # Cross-check the deformable conv (using the same offsets) against the JAX reference.
    out_ref = deform_conv2d_ref(x, off_nchw, params["w_deform"], stride=1, pad=1, dil=1)
    np.testing.assert_allclose(np.asarray(out), np.asarray(out_ref),
                               rtol=2e-2, atol=2e-2)

    print("KERNEL_OK")
</pallas_src>

<mosaic_0001>
module attributes {stable_mosaic.version = 11 : i64} {
  func.func @kernel(%arg0: i32, %arg1: i32, %arg2: memref<1x18x18x4xf32, #tpu.memory_space<vmem>>, %arg3: memref<18x36xf32, #tpu.memory_space<vmem>>, %arg4: memref<18x1xf32, #tpu.memory_space<vmem>>, %arg5: memref<1x18x128xf32, #tpu.memory_space<vmem>>) attributes {dimension_semantics = [#tpu.dimension_semantics<parallel>, #tpu.dimension_semantics<arbitrary>], iteration_bounds = array<i64: 2, 2>, scalar_prefetch = 0 : i64, scratch_operands = 0 : i64, tpu.core_type = #tpu.core_type<tc>, window_params = [{transform_indices = @transform_0, window_bounds = array<i64: 1, 18, 18, 4>}, {pipeline_mode = #tpu.pipeline_mode<synchronous>, transform_indices = @transform_1, window_bounds = array<i64: 18, 36>}, {pipeline_mode = #tpu.pipeline_mode<synchronous>, transform_indices = @transform_2, window_bounds = array<i64: 18, 1>}, {transform_indices = @transform_3, window_bounds = array<i64: 1, 18, 128>}]} {
    %c8_i32 = arith.constant 8 : i32
    %0 = arith.muli %arg1, %c8_i32 : i32
    %1 = tpu.assume_multiple %0, 8 : i32
    %c0 = arith.constant 0 : index
    %2 = arith.index_cast %1 : i32 to index
    %c0_0 = arith.constant 0 : index
    %c0_1 = arith.constant 0 : index
    %3 = vector.load %arg2[%c0, %2, %c0_0, %c0_1] : memref<1x18x18x4xf32, #tpu.memory_space<vmem>>, vector<1x10x18x4xf32>
    %4 = vector.shape_cast %3 : vector<1x10x18x4xf32> to vector<10x18x4xf32>
    %5 = vector.extract_strided_slice %4 {offsets = [0, 0, 0], sizes = [1, 16, 4], strides = [1, 1, 1]} : vector<10x18x4xf32> to vector<1x16x4xf32>
    %6 = vector.shape_cast %5 : vector<1x16x4xf32> to vector<16x4xf32>
    %7 = vector.extract_strided_slice %4 {offsets = [1, 0, 0], sizes = [1, 16, 4], strides = [1, 1, 1]} : vector<10x18x4xf32> to vector<1x16x4xf32>
    %8 = vector.shape_cast %7 : vector<1x16x4xf32> to vector<16x4xf32>
    %9 = vector.extract_strided_slice %4 {offsets = [2, 0, 0], sizes = [1, 16, 4], strides = [1, 1, 1]} : vector<10x18x4xf32> to vector<1x16x4xf32>
    %10 = vector.shape_cast %9 : vector<1x16x4xf32> to vector<16x4xf32>
    %11 = vector.extract_strided_slice %4 {offsets = [3, 0, 0], sizes = [1, 16, 4], strides = [1, 1, 1]} : vector<10x18x4xf32> to vector<1x16x4xf32>
    %12 = vector.shape_cast %11 : vector<1x16x4xf32> to vector<16x4xf32>
    %13 = vector.extract_strided_slice %4 {offsets = [4, 0, 0], sizes = [1, 16, 4], strides = [1, 1, 1]} : vector<10x18x4xf32> to vector<1x16x4xf32>
    %14 = vector.shape_cast %13 : vector<1x16x4xf32> to vector<16x4xf32>
    %15 = vector.extract_strided_slice %4 {offsets = [5, 0, 0], sizes = [1, 16, 4], strides = [1, 1, 1]} : vector<10x18x4xf32> to vector<1x16x4xf32>
    %16 = vector.shape_cast %15 : vector<1x16x4xf32> to vector<16x4xf32>
    %17 = vector.extract_strided_slice %4 {offsets = [6, 0, 0], sizes = [1, 16, 4], strides = [1, 1, 1]} : vector<10x18x4xf32> to vector<1x16x4xf32>
    %18 = vector.shape_cast %17 : vector<1x16x4xf32> to vector<16x4xf32>
    %19 = vector.extract_strided_slice %4 {offsets = [7, 0, 0], sizes = [1, 16, 4], strides = [1, 1, 1]} : vector<10x18x4xf32> to vector<1x16x4xf32>
    %20 = vector.shape_cast %19 : vector<1x16x4xf32> to vector<16x4xf32>
    %21 = tpu.concatenate %6, %8, %10, %12, %14, %16, %18, %20 in 0 : vector<16x4xf32>, vector<16x4xf32>, vector<16x4xf32>, vector<16x4xf32>, vector<16x4xf32>, vector<16x4xf32>, vector<16x4xf32>, vector<16x4xf32> -> vector<128x4xf32>
    %22 = vector.extract_strided_slice %4 {offsets = [0, 1, 0], sizes = [1, 16, 4], strides = [1, 1, 1]} : vector<10x18x4xf32> to vector<1x16x4xf32>
    %23 = vector.shape_cast %22 : vector<1x16x4xf32> to vector<16x4xf32>
    %24 = vector.extract_strided_slice %4 {offsets = [1, 1, 0], sizes = [1, 16, 4], strides = [1, 1, 1]} : vector<10x18x4xf32> to vector<1x16x4xf32>
    %25 = vector.shape_cast %24 : vector<1x16x4xf32> to vector<16x4xf32>
    %26 = vector.extract_strided_slice %4 {offsets = [2, 1, 0], sizes = [1, 16, 4], strides = [1, 1, 1]} : vector<10x18x4xf32> to vector<1x16x4xf32>
    %27 = vector.shape_cast %26 : vector<1x16x4xf32> to vector<16x4xf32>
    %28 = vector.extract_strided_slice %4 {offsets = [3, 1, 0], sizes = [1, 16, 4], strides = [1, 1, 1]} : vector<10x18x4xf32> to vector<1x16x4xf32>
    %29 = vector.shape_cast %28 : vector<1x16x4xf32> to vector<16x4xf32>
    %30 = vector.extract_strided_slice %4 {offsets = [4, 1, 0], sizes = [1, 16, 4], strides = [1, 1, 1]} : vector<10x18x4xf32> to vector<1x16x4xf32>
    %31 = vector.shape_cast %30 : vector<1x16x4xf32> to vector<16x4xf32>
    %32 = vector.extract_strided_slice %4 {offsets = [5, 1, 0], sizes = [1, 16, 4], strides = [1, 1, 1]} : vector<10x18x4xf32> to vector<1x16x4xf32>
    %33 = vector.shape_cast %32 : vector<1x16x4xf32> to vector<16x4xf32>
    %34 = vector.extract_strided_slice %4 {offsets = [6, 1, 0], sizes = [1, 16, 4], strides = [1, 1, 1]} : vector<10x18x4xf32> to vector<1x16x4xf32>
    %35 = vector.shape_cast %34 : vector<1x16x4xf32> to vector<16x4xf32>
    %36 = vector.extract_strided_slice %4 {offsets = [7, 1, 0], sizes = [1, 16, 4], strides = [1, 1, 1]} : vector<10x18x4xf32> to vector<1x16x4xf32>
    %37 = vector.shape_cast %36 : vector<1x16x4xf32> to vector<16x4xf32>
    %38 = tpu.concatenate %23, %25, %27, %29, %31, %33, %35, %37 in 0 : vector<16x4xf32>, vector<16x4xf32>, vector<16x4xf32>, vector<16x4xf32>, vector<16x4xf32>, vector<16x4xf32>, vector<16x4xf32>, vector<16x4xf32> -> vector<128x4xf32>
    %39 = vector.extract_strided_slice %4 {offsets = [0, 2, 0], sizes = [1, 16, 4], strides = [1, 1, 1]} : vector<10x18x4xf32> to vector<1x16x4xf32>
    %40 = vector.shape_cast %39 : vector<1x16x4xf32> to vector<16x4xf32>
    %41 = vector.extract_strided_slice %4 {offsets = [1, 2, 0], sizes = [1, 16, 4], strides = [1, 1, 1]} : vector<10x18x4xf32> to vector<1x16x4xf32>
    %42 = vector.shape_cast %41 : vector<1x16x4xf32> to vector<16x4xf32>
    %43 = vector.extract_strided_slice %4 {offsets = [2, 2, 0], sizes = [1, 16, 4], strides = [1, 1, 1]} : vector<10x18x4xf32> to vector<1x16x4xf32>
    %44 = vector.shape_cast %43 : vector<1x16x4xf32> to vector<16x4xf32>
    %45 = vector.extract_strided_slice %4 {offsets = [3, 2, 0], sizes = [1, 16, 4], strides = [1, 1, 1]} : vector<10x18x4xf32> to vector<1x16x4xf32>
    %46 = vector.shape_cast %45 : vector<1x16x4xf32> to vector<16x4xf32>
    %47 = vector.extract_strided_slice %4 {offsets = [4, 2, 0], sizes = [1, 16, 4], strides = [1, 1, 1]} : vector<10x18x4xf32> to vector<1x16x4xf32>
    %48 = vector.shape_cast %47 : vector<1x16x4xf32> to vector<16x4xf32>
    %49 = vector.extract_strided_slice %4 {offsets = [5, 2, 0], sizes = [1, 16, 4], strides = [1, 1, 1]} : vector<10x18x4xf32> to vector<1x16x4xf32>
    %50 = vector.shape_cast %49 : vector<1x16x4xf32> to vector<16x4xf32>
    %51 = vector.extract_strided_slice %4 {offsets = [6, 2, 0], sizes = [1, 16, 4], strides = [1, 1, 1]} : vector<10x18x4xf32> to vector<1x16x4xf32>
    %52 = vector.shape_cast %51 : vector<1x16x4xf32> to vector<16x4xf32>
    %53 = vector.extract_strided_slice %4 {offsets = [7, 2, 0], sizes = [1, 16, 4], strides = [1, 1, 1]} : vector<10x18x4xf32> to vector<1x16x4xf32>
    %54 = vector.shape_cast %53 : vector<1x16x4xf32> to vector<16x4xf32>
    %55 = tpu.concatenate %40, %42, %44, %46, %48, %50, %52, %54 in 0 : vector<16x4xf32>, vector<16x4xf32>, vector<16x4xf32>, vector<16x4xf32>, vector<16x4xf32>, vector<16x4xf32>, vector<16x4xf32>, vector<16x4xf32> -> vector<128x4xf32>
    %56 = vector.extract_strided_slice %4 {offsets = [1, 0, 0], sizes = [1, 16, 4], strides = [1, 1, 1]} : vector<10x18x4xf32> to vector<1x16x4xf32>
    %57 = vector.shape_cast %56 : vector<1x16x4xf32> to vector<16x4xf32>
    %58 = vector.extract_strided_slice %4 {offsets = [2, 0, 0], sizes = [1, 16, 4], strides = [1, 1, 1]} : vector<10x18x4xf32> to vector<1x16x4xf32>
    %59 = vector.shape_cast %58 : vector<1x16x4xf32> to vector<16x4xf32>
    %60 = vector.extract_strided_slice %4 {offsets = [3, 0, 0], sizes = [1, 16, 4], strides = [1, 1, 1]} : vector<10x18x4xf32> to vector<1x16x4xf32>
    %61 = vector.shape_cast %60 : vector<1x16x4xf32> to vector<16x4xf32>
    %62 = vector.extract_strided_slice %4 {offsets = [4, 0, 0], sizes = [1, 16, 4], strides = [1, 1, 1]} : vector<10x18x4xf32> to vector<1x16x4xf32>
    %63 = vector.shape_cast %62 : vector<1x16x4xf32> to vector<16x4xf32>
    %64 = vector.extract_strided_slice %4 {offsets = [5, 0, 0], sizes = [1, 16, 4], strides = [1, 1, 1]} : vector<10x18x4xf32> to vector<1x16x4xf32>
    %65 = vector.shape_cast %64 : vector<1x16x4xf32> to vector<16x4xf32>
    %66 = vector.extract_strided_slice %4 {offsets = [6, 0, 0], sizes = [1, 16, 4], strides = [1, 1, 1]} : vector<10x18x4xf32> to vector<1x16x4xf32>
    %67 = vector.shape_cast %66 : vector<1x16x4xf32> to vector<16x4xf32>
    %68 = vector.extract_strided_slice %4 {offsets = [7, 0, 0], sizes = [1, 16, 4], strides = [1, 1, 1]} : vector<10x18x4xf32> to vector<1x16x4xf32>
    %69 = vector.shape_cast %68 : vector<1x16x4xf32> to vector<16x4xf32>
    %70 = vector.extract_strided_slice %4 {offsets = [8, 0, 0], sizes = [1, 16, 4], strides = [1, 1, 1]} : vector<10x18x4xf32> to vector<1x16x4xf32>
    %71 = vector.shape_cast %70 : vector<1x16x4xf32> to vector<16x4xf32>
    %72 = tpu.concatenate %57, %59, %61, %63, %65, %67, %69, %71 in 0 : vector<16x4xf32>, vector<16x4xf32>, vector<16x4xf32>, vector<16x4xf32>, vector<16x4xf32>, vector<16x4xf32>, vector<16x4xf32>, vector<16x4xf32> -> vector<128x4xf32>
    %73 = vector.extract_strided_slice %4 {offsets = [1, 1, 0], sizes = [1, 16, 4], strides = [1, 1, 1]} : vector<10x18x4xf32> to vector<1x16x4xf32>
    %74 = vector.shape_cast %73 : vector<1x16x4xf32> to vector<16x4xf32>
    %75 = vector.extract_strided_slice %4 {offsets = [2, 1, 0], sizes = [1, 16, 4], strides = [1, 1, 1]} : vector<10x18x4xf32> to vector<1x16x4xf32>
    %76 = vector.shape_cast %75 : vector<1x16x4xf32> to vector<16x4xf32>
    %77 = vector.extract_strided_slice %4 {offsets = [3, 1, 0], sizes = [1, 16, 4], strides = [1, 1, 1]} : vector<10x18x4xf32> to vector<1x16x4xf32>
    %78 = vector.shape_cast %77 : vector<1x16x4xf32> to vector<16x4xf32>
    %79 = vector.extract_strided_slice %4 {offsets = [4, 1, 0], sizes = [1, 16, 4], strides = [1, 1, 1]} : vector<10x18x4xf32> to vector<1x16x4xf32>
    %80 = vector.shape_cast %79 : vector<1x16x4xf32> to vector<16x4xf32>
    %81 = vector.extract_strided_slice %4 {offsets = [5, 1, 0], sizes = [1, 16, 4], strides = [1, 1, 1]} : vector<10x18x4xf32> to vector<1x16x4xf32>
    %82 = vector.shape_cast %81 : vector<1x16x4xf32> to vector<16x4xf32>
    %83 = vector.extract_strided_slice %4 {offsets = [6, 1, 0], sizes = [1, 16, 4], strides = [1, 1, 1]} : vector<10x18x4xf32> to vector<1x16x4xf32>
    %84 = vector.shape_cast %83 : vector<1x16x4xf32> to vector<16x4xf32>
    %85 = vector.extract_strided_slice %4 {offsets = [7, 1, 0], sizes = [1, 16, 4], strides = [1, 1, 1]} : vector<10x18x4xf32> to vector<1x16x4xf32>
    %86 = vector.shape_cast %85 : vector<1x16x4xf32> to vector<16x4xf32>
    %87 = vector.extract_strided_slice %4 {offsets = [8, 1, 0], sizes = [1, 16, 4], strides = [1, 1, 1]} : vector<10x18x4xf32> to vector<1x16x4xf32>
    %88 = vector.shape_cast %87 : vector<1x16x4xf32> to vector<16x4xf32>
    %89 = tpu.concatenate %74, %76, %78, %80, %82, %84, %86, %88 in 0 : vector<16x4xf32>, vector<16x4xf32>, vector<16x4xf32>, vector<16x4xf32>, vector<16x4xf32>, vector<16x4xf32>, vector<16x4xf32>, vector<16x4xf32> -> vector<128x4xf32>
    %90 = vector.extract_strided_slice %4 {offsets = [1, 2, 0], sizes = [1, 16, 4], strides = [1, 1, 1]} : vector<10x18x4xf32> to vector<1x16x4xf32>
    %91 = vector.shape_cast %90 : vector<1x16x4xf32> to vector<16x4xf32>
    %92 = vector.extract_strided_slice %4 {offsets = [2, 2, 0], sizes = [1, 16, 4], strides = [1, 1, 1]} : vector<10x18x4xf32> to vector<1x16x4xf32>
    %93 = vector.shape_cast %92 : vector<1x16x4xf32> to vector<16x4xf32>
    %94 = vector.extract_strided_slice %4 {offsets = [3, 2, 0], sizes = [1, 16, 4], strides = [1, 1, 1]} : vector<10x18x4xf32> to vector<1x16x4xf32>
    %95 = vector.shape_cast %94 : vector<1x16x4xf32> to vector<16x4xf32>
    %96 = vector.extract_strided_slice %4 {offsets = [4, 2, 0], sizes = [1, 16, 4], strides = [1, 1, 1]} : vector<10x18x4xf32> to vector<1x16x4xf32>
    %97 = vector.shape_cast %96 : vector<1x16x4xf32> to vector<16x4xf32>
    %98 = vector.extract_strided_slice %4 {offsets = [5, 2, 0], sizes = [1, 16, 4], strides = [1, 1, 1]} : vector<10x18x4xf32> to vector<1x16x4xf32>
    %99 = vector.shape_cast %98 : vector<1x16x4xf32> to vector<16x4xf32>
    %100 = vector.extract_strided_slice %4 {offsets = [6, 2, 0], sizes = [1, 16, 4], strides = [1, 1, 1]} : vector<10x18x4xf32> to vector<1x16x4xf32>
    %101 = vector.shape_cast %100 : vector<1x16x4xf32> to vector<16x4xf32>
    %102 = vector.extract_strided_slice %4 {offsets = [7, 2, 0], sizes = [1, 16, 4], strides = [1, 1, 1]} : vector<10x18x4xf32> to vector<1x16x4xf32>
    %103 = vector.shape_cast %102 : vector<1x16x4xf32> to vector<16x4xf32>
    %104 = vector.extract_strided_slice %4 {offsets = [8, 2, 0], sizes = [1, 16, 4], strides = [1, 1, 1]} : vector<10x18x4xf32> to vector<1x16x4xf32>
    %105 = vector.shape_cast %104 : vector<1x16x4xf32> to vector<16x4xf32>
    %106 = tpu.concatenate %91, %93, %95, %97, %99, %101, %103, %105 in 0 : vector<16x4xf32>, vector<16x4xf32>, vector<16x4xf32>, vector<16x4xf32>, vector<16x4xf32>, vector<16x4xf32>, vector<16x4xf32>, vector<16x4xf32> -> vector<128x4xf32>
    %107 = vector.extract_strided_slice %4 {offsets = [2, 0, 0], sizes = [1, 16, 4], strides = [1, 1, 1]} : vector<10x18x4xf32> to vector<1x16x4xf32>
    %108 = vector.shape_cast %107 : vector<1x16x4xf32> to vector<16x4xf32>
    %109 = vector.extract_strided_slice %4 {offsets = [3, 0, 0], sizes = [1, 16, 4], strides = [1, 1, 1]} : vector<10x18x4xf32> to vector<1x16x4xf32>
    %110 = vector.shape_cast %109 : vector<1x16x4xf32> to vector<16x4xf32>
    %111 = vector.extract_strided_slice %4 {offsets = [4, 0, 0], sizes = [1, 16, 4], strides = [1, 1, 1]} : vector<10x18x4xf32> to vector<1x16x4xf32>
    %112 = vector.shape_cast %111 : vector<1x16x4xf32> to vector<16x4xf32>
    %113 = vector.extract_strided_slice %4 {offsets = [5, 0, 0], sizes = [1, 16, 4], strides = [1, 1, 1]} : vector<10x18x4xf32> to vector<1x16x4xf32>
    %114 = vector.shape_cast %113 : vector<1x16x4xf32> to vector<16x4xf32>
    %115 = vector.extract_strided_slice %4 {offsets = [6, 0, 0], sizes = [1, 16, 4], strides = [1, 1, 1]} : vector<10x18x4xf32> to vector<1x16x4xf32>
    %116 = vector.shape_cast %115 : vector<1x16x4xf32> to vector<16x4xf32>
    %117 = vector.extract_strided_slice %4 {offsets = [7, 0, 0], sizes = [1, 16, 4], strides = [1, 1, 1]} : vector<10x18x4xf32> to vector<1x16x4xf32>
    %118 = vector.shape_cast %117 : vector<1x16x4xf32> to vector<16x4xf32>
    %119 = vector.extract_strided_slice %4 {offsets = [8, 0, 0], sizes = [1, 16, 4], strides = [1, 1, 1]} : vector<10x18x4xf32> to vector<1x16x4xf32>
    %120 = vector.shape_cast %119 : vector<1x16x4xf32> to vector<16x4xf32>
    %121 = vector.extract_strided_slice %4 {offsets = [9, 0, 0], sizes = [1, 16, 4], strides = [1, 1, 1]} : vector<10x18x4xf32> to vector<1x16x4xf32>
    %122 = vector.shape_cast %121 : vector<1x16x4xf32> to vector<16x4xf32>
    %123 = tpu.concatenate %108, %110, %112, %114, %116, %118, %120, %122 in 0 : vector<16x4xf32>, vector<16x4xf32>, vector<16x4xf32>, vector<16x4xf32>, vector<16x4xf32>, vector<16x4xf32>, vector<16x4xf32>, vector<16x4xf32> -> vector<128x4xf32>
    %124 = vector.extract_strided_slice %4 {offsets = [2, 1, 0], sizes = [1, 16, 4], strides = [1, 1, 1]} : vector<10x18x4xf32> to vector<1x16x4xf32>
    %125 = vector.shape_cast %124 : vector<1x16x4xf32> to vector<16x4xf32>
    %126 = vector.extract_strided_slice %4 {offsets = [3, 1, 0], sizes = [1, 16, 4], strides = [1, 1, 1]} : vector<10x18x4xf32> to vector<1x16x4xf32>
    %127 = vector.shape_cast %126 : vector<1x16x4xf32> to vector<16x4xf32>
    %128 = vector.extract_strided_slice %4 {offsets = [4, 1, 0], sizes = [1, 16, 4], strides = [1, 1, 1]} : vector<10x18x4xf32> to vector<1x16x4xf32>
    %129 = vector.shape_cast %128 : vector<1x16x4xf32> to vector<16x4xf32>
    %130 = vector.extract_strided_slice %4 {offsets = [5, 1, 0], sizes = [1, 16, 4], strides = [1, 1, 1]} : vector<10x18x4xf32> to vector<1x16x4xf32>
    %131 = vector.shape_cast %130 : vector<1x16x4xf32> to vector<16x4xf32>
    %132 = vector.extract_strided_slice %4 {offsets = [6, 1, 0], sizes = [1, 16, 4], strides = [1, 1, 1]} : vector<10x18x4xf32> to vector<1x16x4xf32>
    %133 = vector.shape_cast %132 : vector<1x16x4xf32> to vector<16x4xf32>
    %134 = vector.extract_strided_slice %4 {offsets = [7, 1, 0], sizes = [1, 16, 4], strides = [1, 1, 1]} : vector<10x18x4xf32> to vector<1x16x4xf32>
    %135 = vector.shape_cast %134 : vector<1x16x4xf32> to vector<16x4xf32>
    %136 = vector.extract_strided_slice %4 {offsets = [8, 1, 0], sizes = [1, 16, 4], strides = [1, 1, 1]} : vector<10x18x4xf32> to vector<1x16x4xf32>
    %137 = vector.shape_cast %136 : vector<1x16x4xf32> to vector<16x4xf32>
    %138 = vector.extract_strided_slice %4 {offsets = [9, 1, 0], sizes = [1, 16, 4], strides = [1, 1, 1]} : vector<10x18x4xf32> to vector<1x16x4xf32>
    %139 = vector.shape_cast %138 : vector<1x16x4xf32> to vector<16x4xf32>
    %140 = tpu.concatenate %125, %127, %129, %131, %133, %135, %137, %139 in 0 : vector<16x4xf32>, vector<16x4xf32>, vector<16x4xf32>, vector<16x4xf32>, vector<16x4xf32>, vector<16x4xf32>, vector<16x4xf32>, vector<16x4xf32> -> vector<128x4xf32>
    %141 = vector.extract_strided_slice %4 {offsets = [2, 2, 0], sizes = [1, 16, 4], strides = [1, 1, 1]} : vector<10x18x4xf32> to vector<1x16x4xf32>
    %142 = vector.shape_cast %141 : vector<1x16x4xf32> to vector<16x4xf32>
    %143 = vector.extract_strided_slice %4 {offsets = [3, 2, 0], sizes = [1, 16, 4], strides = [1, 1, 1]} : vector<10x18x4xf32> to vector<1x16x4xf32>
    %144 = vector.shape_cast %143 : vector<1x16x4xf32> to vector<16x4xf32>
    %145 = vector.extract_strided_slice %4 {offsets = [4, 2, 0], sizes = [1, 16, 4], strides = [1, 1, 1]} : vector<10x18x4xf32> to vector<1x16x4xf32>
    %146 = vector.shape_cast %145 : vector<1x16x4xf32> to vector<16x4xf32>
    %147 = vector.extract_strided_slice %4 {offsets = [5, 2, 0], sizes = [1, 16, 4], strides = [1, 1, 1]} : vector<10x18x4xf32> to vector<1x16x4xf32>
    %148 = vector.shape_cast %147 : vector<1x16x4xf32> to vector<16x4xf32>
    %149 = vector.extract_strided_slice %4 {offsets = [6, 2, 0], sizes = [1, 16, 4], strides = [1, 1, 1]} : vector<10x18x4xf32> to vector<1x16x4xf32>
    %150 = vector.shape_cast %149 : vector<1x16x4xf32> to vector<16x4xf32>
    %151 = vector.extract_strided_slice %4 {offsets = [7, 2, 0], sizes = [1, 16, 4], strides = [1, 1, 1]} : vector<10x18x4xf32> to vector<1x16x4xf32>
    %152 = vector.shape_cast %151 : vector<1x16x4xf32> to vector<16x4xf32>
    %153 = vector.extract_strided_slice %4 {offsets = [8, 2, 0], sizes = [1, 16, 4], strides = [1, 1, 1]} : vector<10x18x4xf32> to vector<1x16x4xf32>
    %154 = vector.shape_cast %153 : vector<1x16x4xf32> to vector<16x4xf32>
    %155 = vector.extract_strided_slice %4 {offsets = [9, 2, 0], sizes = [1, 16, 4], strides = [1, 1, 1]} : vector<10x18x4xf32> to vector<1x16x4xf32>
    %156 = vector.shape_cast %155 : vector<1x16x4xf32> to vector<16x4xf32>
    %157 = tpu.concatenate %142, %144, %146, %148, %150, %152, %154, %156 in 0 : vector<16x4xf32>, vector<16x4xf32>, vector<16x4xf32>, vector<16x4xf32>, vector<16x4xf32>, vector<16x4xf32>, vector<16x4xf32>, vector<16x4xf32> -> vector<128x4xf32>
    %158 = tpu.concatenate %21, %38, %55, %72, %89, %106, %123, %140, %157 in 1 : vector<128x4xf32>, vector<128x4xf32>, vector<128x4xf32>, vector<128x4xf32>, vector<128x4xf32>, vector<128x4xf32>, vector<128x4xf32>, vector<128x4xf32>, vector<128x4xf32> -> vector<128x36xf32>
    %c0_2 = arith.constant 0 : index
    %c0_3 = arith.constant 0 : index
    %159 = vector.load %arg3[%c0_2, %c0_3] : memref<18x36xf32, #tpu.memory_space<vmem>>, vector<18x36xf32>
    %cst = arith.constant dense<0.000000e+00> : vector<18x128xf32>
    %160 = tpu.matmul %159, %158, %cst {dimension_numbers = #tpu.dot_dimension_numbers<[1], [1], [0], [0], [0, 0, 1, 0], [], []>} : vector<18x36xf32>, vector<128x36xf32>, vector<18x128xf32> -> vector<18x128xf32>
    %c0_4 = arith.constant 0 : index
    %c0_5 = arith.constant 0 : index
    %161 = vector.load %arg4[%c0_4, %c0_5] : memref<18x1xf32, #tpu.memory_space<vmem>>, vector<18x1xf32>
    %162 = vector.broadcast %161 : vector<18x1xf32> to vector<18x128xf32>
    %163 = arith.addf %160, %162 : vector<18x128xf32>
    %c0_6 = arith.constant 0 : index
    %c0_7 = arith.constant 0 : index
    %c0_8 = arith.constant 0 : index
    %164 = vector.load %arg5[%c0_6, %c0_7, %c0_8] : memref<1x18x128xf32, #tpu.memory_space<vmem>>, vector<1x18x128xf32>
    %165 = vector.shape_cast %164 : vector<1x18x128xf32> to vector<18x128xf32>
    %166 = vector.shape_cast %163 : vector<18x128xf32> to vector<1x18x128xf32>
    tpu.vector_store %arg5[%c0_6, %c0_7, %c0_8], %166 {strides = array<i32>} : memref<1x18x128xf32, #tpu.memory_space<vmem>>, vector<1x18x128xf32>,
    return
  }
  func.func @transform_0(%arg0: i32, %arg1: i32) -> (i32, i32, i32, i32) {
    %c0_i32 = arith.constant 0 : i32
    %c0_i32_0 = arith.constant 0 : i32
    %c0_i32_1 = arith.constant 0 : i32
    %c0_i32_2 = arith.constant 0 : i32
    return %arg0, %c0_i32, %c0_i32_0, %c0_i32_1 : i32, i32, i32, i32
  }
  func.func @transform_1(%arg0: i32, %arg1: i32) -> (i32, i32) {
    %c0_i32 = arith.constant 0 : i32
    %c0_i32_0 = arith.constant 0 : i32
    %c0_i32_1 = arith.constant 0 : i32
    return %c0_i32, %c0_i32_0 : i32, i32
  }
  func.func @transform_2(%arg0: i32, %arg1: i32) -> (i32, i32) {
    %c0_i32 = arith.constant 0 : i32
    %c0_i32_0 = arith.constant 0 : i32
    %c0_i32_1 = arith.constant 0 : i32
    return %c0_i32, %c0_i32_0 : i32, i32
  }
  func.func @transform_3(%arg0: i32, %arg1: i32) -> (i32, i32, i32) {
    %c0_i32 = arith.constant 0 : i32
    %c0_i32_0 = arith.constant 0 : i32
    return %arg0, %c0_i32, %arg1 : i32, i32, i32
  }
}

</mosaic_0001>

<bundles_post_ra>
// kernel: tpu_custom_call.1
= control target key start
LH: loop header
LB: loop body
LE: loop exit
PB: predicated region body
PF: predicated region fallthrough
CT: control target
= control target key end

     0   :  { %s1308_s12 = smov 0   ;;  %s1310_s13 = smov 0   ;;  %s2180_s0 = inlined_call_operand.vmem [shape: f32[2,18,18,4], index: 0, kind: input, shape index: {}]   ;;  %s2181_s1 = inlined_call_operand.vmem [shape: f32[18,36], index: 1, kind: input, shape index: {}]   ;;  %s2182_s2 = inlined_call_operand.vmem [shape: f32[18,1], index: 2, kind: input, shape index: {}]   ;;  %s2183_s3 = inlined_call_operand.vmem [shape: f32[2,18,256], index: 3, kind: output, shape index: {}]  }
   0x1   :  { %s1312_s14 = smov 0   ;;  %s1314_s15 = smov 0  }
   0x2   :  { %s1316_s16 = smov 0   ;;  %s1318_s17 = smov 0  }
   0x3   :  { %s1320_s18 = smov 0  }
   0x4 LB: > { %s22_s19 = sadd.s32 1, %s1269_s16  ;;  %s25_s20 = sadd.s32 1, %s1273_s17  ;;  %s1277_s18 = sphi %s1320_s18, %s13_s18   ;;  %s1273_s17 = sphi %s1318_s17, %s2231_s17   ;;  %s1269_s16 = sphi %s1316_s16, %s2230_s16   ;;  %s1265_s15 = sphi %s1314_s15, %s2229_s15   ;;  %s1261_s14 = sphi %s1312_s14, %s2228_s14   ;;  %s1257_s13 = sphi %s1310_s13, %s2227_s13   ;;  %s1253_s12 = sphi %s1308_s12, %s2226_s12  }
   0x5   : > { %p23_p0 = scmp.ge.s32.totalorder %s22_s19, 2  ;;  %s1090_s21 = sadd.s32 4294967295, %s1277_s18  }
   0x6   : > { %p112_p1 = scmp.ne.s32.totalorder %s1257_s13, %s1253_s12  ;;  %p113_p2 = scmp.eq.s32.totalorder %s1090_s21, 3 }
   0x7   : > { %s2233_s19 = smov (%p23_p0, %s22_s19), 0  ;;  %s2235_s20 = smov (!%p23_p0, %s25_s20), %s1273_s17 }
   0x8   : > { %s98_s22 = ssub.s32 %s1269_s16, %s2233_s19  ;;  %p27_p3 = scmp.ge.s32.totalorder %s2235_s20, 2 }
   0x9   : > { %p1094_p4 = scmp.ge.s32.totalorder %s1277_s18, 1  ;;  %p1354_p5 = por %p113_p2, %p112_p1 }
   0xa   : > { %p151_p6 = scmp.lt.s32.totalorder %s1277_s18, 5  ;;  %s2237_s20 = smov (%p27_p3, %s2235_s20), 0 }
   0xb   : > { %s97_s24 = ssub.s32 %s1273_s17, %s2237_s20  ;;  %s102_s26 = sadd.s32 1, %s1257_s13 }
   0xc   : > { %p152_p7 = pnand %p1094_p4, %p151_p6  ;;  %s99_s25 = sor.u32 %s98_s22, %s97_s24 }
   0xd   : > { %p100_p8 = scmp.eq.s32.totalorder %s99_s25, 0 }
   0xe   : > { %155 = sbr.rel (%p152_p7) target bundleno = 632 (0x278), region = 32 }
   0xf   : > { %s1365_s27 = scalar_select %p100_p8, %s1257_s13, %s102_s26  }
  0x13   : > { %p174_p9 = scmp.lt.s32.totalorder %s1265_s15, 1  ;;  %s1097_s29 = smul.u32 192, %s1261_s14  ;;  %vm215_vm0 = vcmask 1046528   ;;  %vm277_vm1 = vcmask 1045504   ;;  %vm745_vm2 = vcmask 64512   ;;  %vm728_vm3 = vcmask 31744  }
  0x14   : > { %s1279_s8 = smov 4   ;;  %s1280_s9 = smov 8   ;;  %vm762_vm4 = vcmask 97280   ;;  %vm779_vm5 = vcmask 130048   ;;  %vm796_vm6 = vcmask 162816   ;;  %vm813_vm7 = vcmask 195584  }
  0x15   : > { %s175_s28 = scalar_select %p174_p9, %s1265_s15, 1  ;;  %vm830_vm8 = vcmask 228352   ;;  %vm847_vm9 = vcmask 261120   ;;  %vm885_vm10 = vcmask 293888  }
  0x16   : > { %s1281_s10 = smov 12   ;;  %s1282_s11 = smov 16  }
  0x17   : > { %s1153_s30 = smul.u32 432, %s175_s28  ;;  %s1283_s21 = smov 24  }
  0x18   : > { %s1284_s22 = smov 20   ;;  %s1285_s24 = smov 32  }
  0x19   : > { %s178_s6 = scalar_lea.vmem %s2180_s0, %s1153_s30  ;;  %s1286_s25 = smov 28  }
  0x1a   : > { %s1373_s7 = scalar_lea.vmem %s178_s6, %s1097_s29 }
  0x1b   : > { %v1376_v0 = vld [vmem:[%s1373_s7 + $0x30] sm:$0xff]  ;;  %v1379_v1 = vld [vmem:[%s1373_s7 + $0x38] sm:$0xff]  ;;  %v1387_v5 = vld [vmem:[%s1373_s7 + $0x20] sm:$0xff] }
  0x1c   : > { %2202 = vst [vmem:[#allocation3_spill] sm:$0xff] %v1376_v0  ;;  %v1382_v2 = vld [vmem:[%s1373_s7 + $0x18] sm:$0xff]  ;;  %v232_v3 = vrot.slane %v1376_v0, 1  ;;  %v233_v4 = vrot.slane %v1379_v1, 1  ;;  %v1391_v7 = vld [vmem:[%s1373_s7] sm:$0xff]  ;;  %v1394_v8 = vld [vmem:[%s1373_s7 + $0x8] sm:$0xff] }
  0x1d   : > { %v224_v6 = vrot.slane %v1382_v2, 1  ;;  %v225_v9 = vrot.slane %v1387_v5, 1  ;;  %v216_v10 = vrot.slane %v1391_v7, 1  ;;  %v217_v11 = vrot.slane %v1394_v8, 1  ;;  %v1400_v12 = vld [vmem:[%s1373_s7 + $0x40] sm:$0x3] }
  0x1e   : > { %v1403_v13 = vsel %vm215_vm0, %v232_v3, %v233_v4  ;;  %v1406_v14 = vld [vmem:[%s1373_s7 + $0x28] sm:$0x3]  ;;  %v1409_v15 = vld [vmem:[%s1373_s7 + $0x10] sm:$0x3]  ;;  %v235_v18 = vrot.slane %v1400_v12, 1  ;;  %v1431_v24 = vld [vmem:[%s1373_s7 + $0x60] sm:$0xff] }
  0x1f   : > { %2203 = vst [vmem:[#allocation4_spill] sm:$0xff] %v1403_v13  ;;  %352 = vrot.lane.b32.xlu2 %v1403_v13, %s1279_s8  ;;  %v1414_v16 = vsel %vm215_vm0, %v224_v6, %v225_v9  ;;  %v218_v17 = vsel %vm215_vm0, %v216_v10, %v217_v11  ;;  %v227_v19 = vrot.slane %v1406_v14, 1  ;;  %v219_v20 = vrot.slane %v1409_v15, 1  ;;  %v1434_v25 = vld [vmem:[%s1373_s7 + $0x68] sm:$0xff]  ;;  %v1437_v26 = vld [vmem:[%s1373_s7 + $0x50] sm:$0xff]  ;;  %v1465_v37 = vld [vmem:[%s1373_s7 + $0x80] sm:$0xff] }
  0x20   : > { %348 = vrot.lane.b32.xlu1 %v1414_v16, %s1279_s8  ;;  %344 = vrot.lane.b32.xlu0 %v218_v17, %s1279_s8  ;;  %v1424_v21 = vsel %vm215_vm0, %v233_v4, %v235_v18  ;;  %v1440_v27 = vld [vmem:[%s1373_s7 + $0x58] sm:$0x3]  ;;  %v1443_v28 = vld [vmem:[%s1373_s7 + $0x48] sm:$0xff]  ;;  %v248_v29 = vrot.slane %v1431_v24, 1  ;;  %v249_v30 = vrot.slane %v1434_v25, 1  ;;  %v241_v31 = vrot.slane %v1437_v26, 1 }
  0x21   : > { %2204 = vst [vmem:[#allocation5_spill] sm:$0xff] %v1424_v21  ;;  %v1427_v22 = vsel %vm215_vm0, %v225_v9, %v227_v19  ;;  %v220_v23 = vsel %vm215_vm0, %v217_v11, %v219_v20  ;;  %v243_v32 = vrot.slane %v1440_v27, 1  ;;  %v240_v33 = vrot.slane %v1443_v28, 1  ;;  %v1468_v38 = vld [vmem:[%s1373_s7 + $0x88] sm:$0x3]  ;;  %v1471_v39 = vld [vmem:[%s1373_s7 + $0x78] sm:$0xff] }
  0x22   : > { %v1456_v34 = vsel %vm215_vm0, %v248_v29, %v249_v30  ;;  %v1474_v40 = vld [vmem:[%s1373_s7 + $0x70] sm:$0x3]  ;;  %v257_v41 = vrot.slane %v1465_v37, 1  ;;  %v259_v42 = vrot.slane %v1468_v38, 1  ;;  %v256_v43 = vrot.slane %v1471_v39, 1  ;;  %v1496_v48 = vld [vmem:[%s1373_s7 + $0xa8] sm:$0xff] }
  0x23   : > { %v1459_v35 = vsel %vm215_vm0, %v241_v31, %v243_v32  ;;  %v1462_v36 = vsel %vm215_vm0, %v240_v33, %v241_v31  ;;  %v251_v44 = vrot.slane %v1474_v40, 1  ;;  %v1499_v49 = vld [vmem:[%s1373_s7 + $0xb0] sm:$0xff]  ;;  %v1502_v50 = vld [vmem:[%s1373_s7 + $0x98] sm:$0xff]  ;;  %v1505_v51 = vld [vmem:[%s1373_s7 + $0xa0] sm:$0x3]  ;;  %v272_v53 = vrot.slane %v1496_v48, 1 }
  0x24   : > { %2205 = vst [vmem:[#allocation6_spill] sm:$0xff] %v1459_v35  ;;  %v1487_v45 = vsel %vm215_vm0, %v257_v41, %v259_v42  ;;  %v1490_v46 = vsel %vm215_vm0, %v256_v43, %v257_v41  ;;  %v1508_v52 = vld [vmem:[%s1373_s7 + $0x90] sm:$0xff]  ;;  %v273_v54 = vrot.slane %v1499_v49, 1  ;;  %v265_v55 = vrot.slane %v1502_v50, 1  ;;  %v1531_v61 = vld [vmem:[%s1373_s7 + $0xb8] sm:$0x3] }
  0x25   : > { %2206 = vst [vmem:[#allocation7_spill] sm:$0xff] %v1462_v36  ;;  %v1493_v47 = vsel %vm215_vm0, %v249_v30, %v251_v44  ;;  %v267_v56 = vrot.slane %v1505_v51, 1  ;;  %v264_v57 = vrot.slane %v1508_v52, 1  ;;  %v279_v62 = vrot.slane %v1394_v8, 2 }
  0x26   : > { %v1522_v58 = vsel %vm215_vm0, %v272_v53, %v273_v54  ;;  %v281_v63 = vrot.slane %v1409_v15, 2  ;;  %v278_v3 = vrot.slane %v1391_v7, 2  ;;  %v275_v4 = vrot.slane %v1531_v61, 1 }
  0x27   : > { %354 = vrot.lane.b32.xlu2 %v1424_v21, %s1279_s8  ;;  %v1525_v59 = vsel %vm215_vm0, %v265_v55, %v267_v56  ;;  %v1528_v60 = vsel %vm215_vm0, %v264_v57, %v265_v55  ;;  %v288_v11 = vrot.slane %v1376_v0, 2  ;;  %v289_v15 = vrot.slane %v1379_v1, 2 }
  0x28   : > { %350 = vrot.lane.b32.xlu1 %v1427_v22, %s1279_s8  ;;  %346 = vrot.lane.b32.xlu0 %v220_v23, %s1279_s8  ;;  %v282_v6 = vsel %vm277_vm1, %v279_v62, %v281_v63  ;;  %v280_v9 = vsel %vm277_vm1, %v278_v3, %v279_v62  ;;  %v1546_v10 = vsel %vm215_vm0, %v273_v54, %v275_v4  ;;  %v284_v17 = vrot.slane %v1387_v5, 2 }
  0x29   : > { %v286_v18 = vrot.slane %v1406_v14, 2  ;;  %v283_v19 = vrot.slane %v1382_v2, 2  ;;  %v1558_v20 = vsel %vm277_vm1, %v288_v11, %v289_v15  ;;  %v294_v14 = vrot.slane %v1437_v26, 2 }
  0x2a   : > { %2207 = vst [vmem:[#allocation8_spill] sm:$0xff] %v1558_v20  ;;  %v296_v30 = vrot.slane %v1440_v27, 2  ;;  %v293_v31 = vrot.slane %v1443_v28, 2  ;;  %v291_v32 = vrot.slane %v1400_v12, 2  ;;  %v303_v12 = vrot.slane %v1471_v39, 2 }
  0x2b   : > { %v1561_v23 = vsel %vm277_vm1, %v284_v17, %v286_v18  ;;  %v1564_v29 = vsel %vm277_vm1, %v283_v19, %v284_v17  ;;  %v304_v27 = vrot.slane %v1465_v37, 2  ;;  %v299_v43 = vrot.slane %v1434_v25, 2 }
  0x2c   : > { %2208 = vst [vmem:[#allocation9_spill] sm:$0xff] %v1561_v23  ;;  %v1577_v33 = vsel %vm277_vm1, %v294_v14, %v296_v30  ;;  %v1580_v41 = vsel %vm277_vm1, %v293_v31, %v294_v14  ;;  %v1583_v42 = vsel %vm277_vm1, %v289_v15, %v291_v32  ;;  %v301_v44 = vrot.slane %v1474_v40, 2  ;;  %v1667_v31 = vld [vmem:[%s1373_s7 + $0xc8] sm:$0xff]  ;;  %v1670_v32 = vld [vmem:[%s1373_s7 + $0xc0] sm:$0xff] }
  0x2d   : > { %2209 = vst [vmem:[#allocation10_spill] sm:$0xff] %v1564_v29  ;;  %v298_v53 = vrot.slane %v1431_v24, 2  ;;  %v1597_v54 = vsel %vm277_vm1, %v303_v12, %v304_v27  ;;  %v309_v40 = vrot.slane %v1502_v50, 2  ;;  %v311_v57 = vrot.slane %v1505_v51, 2 }
  0x2e   : > { %2210 = vst [vmem:[#allocation11_spill] sm:$0xff] %v1577_v33  ;;  %v1600_v55 = vsel %vm277_vm1, %v299_v43, %v301_v44  ;;  %v308_v62 = vrot.slane %v1508_v52, 2  ;;  %v306_v63 = vrot.slane %v1468_v38, 2  ;;  %v314_v38 = vrot.slane %v1499_v49, 2 }
  0x2f   : > { %360 = vrot.lane.b32.xlu2 %v1456_v34, %s1279_s8  ;;  %2211 = vst [vmem:[#allocation12_spill] sm:$0xff] %v1580_v41  ;;  %v1603_v56 = vsel %vm277_vm1, %v298_v53, %v299_v43  ;;  %v1616_v3 = vsel %vm277_vm1, %v309_v40, %v311_v57  ;;  %v316_v51 = vrot.slane %v1531_v61, 2 }
  0x30   : > { %358 = vrot.lane.b32.xlu1 %v1459_v35, %s1279_s8  ;;  %356 = vrot.lane.b32.xlu0 %v1462_v36, %s1279_s8  ;;  %2212 = vst [vmem:[#allocation13_spill] sm:$0xff] %v1583_v42  ;;  %v1619_v4 = vsel %vm277_vm1, %v308_v62, %v309_v40 }
  0x31   : > { %2213 = vst [vmem:[#allocation14_spill] sm:$0xff] %v1603_v56  ;;  %v1634_v11 = vsel %vm277_vm1, %v314_v38, %v316_v51  ;;  %v322_v51 = vrot.slane %v1667_v31, 1 }
  0x37   : > { %366 = vrot.lane.b32.xlu2 %v1487_v45, %s1279_s8 }
  0x38   : > { %364 = vrot.lane.b32.xlu1 %v1490_v46, %s1279_s8  ;;  %362 = vrot.lane.b32.xlu0 %v1493_v47, %s1279_s8 }
  0x3f   : > { %372 = vrot.lane.b32.xlu2 %v1522_v58, %s1279_s8 }
  0x40   : > { %370 = vrot.lane.b32.xlu1 %v1525_v59, %s1279_s8  ;;  %368 = vrot.lane.b32.xlu0 %v1528_v60, %s1279_s8 }
  0x47   : > { %394 = vrot.lane.b32.xlu2 %v282_v6, %s1280_s9  ;;  %v1622_v6 = vsel %vm277_vm1, %v304_v27, %v306_v63  ;;  %v208_v63 = vld [vmem:[%s1373_s7 + $0xd0] sm:$0x3] }
  0x48   : > { %392 = vrot.lane.b32.xlu1 %v280_v9, %s1280_s9  ;;  %374 = vrot.lane.b32.xlu0 %v1546_v10, %s1279_s8  ;;  %v313_v9 = vrot.slane %v1496_v48, 2 }
  0x4a   : > { %v1637_v15 = vsel %vm277_vm1, %v313_v9, %v314_v38  ;;  %v329_v38 = vrot.slane %v208_v63, 2  ;;  %v324_v9 = vrot.slane %v208_v63, 1 }
  0x4f   : > { %400 = vrot.lane.b32.xlu2 %v1558_v20, %s1280_s9 }
  0x50   : > { %398 = vrot.lane.b32.xlu1 %v1561_v23, %s1280_s9  ;;  %396 = vrot.lane.b32.xlu0 %v1564_v29, %s1280_s9  ;;  %v1713_v29 = vsel %vm215_vm0, %v322_v51, %v324_v9  ;;  %v321_v9 = vrot.slane %v1670_v32, 1 }
  0x57   : > { %406 = vrot.lane.b32.xlu2 %v1577_v33, %s1280_s9 }
  0x58   : > { %404 = vrot.lane.b32.xlu1 %v1580_v41, %s1280_s9  ;;  %402 = vrot.lane.b32.xlu0 %v1583_v42, %s1280_s9  ;;  %v1731_v41 = vsel %vm215_vm0, %v321_v9, %v322_v51  ;;  %v326_v51 = vrot.slane %v1670_v32, 2 }
  0x5f   : > { %412 = vrot.lane.b32.xlu2 %v1597_v54, %s1280_s9 }
  0x60   : > { %410 = vrot.lane.b32.xlu1 %v1600_v55, %s1280_s9  ;;  %408 = vrot.lane.b32.xlu0 %v1603_v56, %s1280_s9  ;;  %v209_v56 = vld [vmem:[%s1373_s7 + $0xd8] sm:$0xff] }
  0x67   : > { %418 = vrot.lane.b32.xlu2 %v1616_v3, %s1280_s9 }
  0x68   : > { %416 = vrot.lane.b32.xlu1 %v1619_v4, %s1280_s9  ;;  %414 = vrot.lane.b32.xlu0 %v1622_v6, %s1280_s9 }
  0x6f   : > { %440 = vrot.lane.b32.xlu2 %v1382_v2, %s1281_s10 }
  0x70   : > { %422 = vrot.lane.b32.xlu1 %v1634_v11, %s1280_s9  ;;  %420 = vrot.lane.b32.xlu0 %v1637_v15, %s1280_s9 }
  0x77   : > { %446 = vrot.lane.b32.xlu2 %v1379_v1, %s1281_s10 }
  0x78   : > { %444 = vrot.lane.b32.xlu1 %v1376_v0, %s1281_s10  ;;  %442 = vrot.lane.b32.xlu0 %v1387_v5, %s1281_s10 }
  0x79   : > { %v353_v61 = vpop.permute.xlu2 %352 }
  0x7f   : > { %452 = vrot.lane.b32.xlu2 %v1431_v24, %s1281_s10 }
  0x80   : > { %450 = vrot.lane.b32.xlu1 %v1437_v26, %s1281_s10  ;;  %448 = vrot.lane.b32.xlu0 %v1443_v28, %s1281_s10 }
  0x81   : > { %v1650_v17 = vpop.permute.xlu2 %354 }
  0x87   : > { %458 = vrot.lane.b32.xlu2 %v1465_v37, %s1281_s10 }
  0x88   : > { %456 = vrot.lane.b32.xlu1 %v1471_v39, %s1281_s10  ;;  %454 = vrot.lane.b32.xlu0 %v1434_v25, %s1281_s10 }
  0x89   : > { %v1655_v18 = vpop.permute.xlu2 %360 }
  0x8f   : > { %464 = vrot.lane.b32.xlu2 %v1496_v48, %s1281_s10 }
  0x90   : > { %462 = vrot.lane.b32.xlu1 %v1502_v50, %s1281_s10  ;;  %460 = vrot.lane.b32.xlu0 %v1508_v52, %s1281_s10 }
  0x91   : > { %v1660_v19 = vpop.permute.xlu2 %366 }
  0x92   : > { %v1662_v14 = vpop.permute.xlu1 %348  ;;  %v1664_v30 = vpop.permute.xlu0 %344 }
  0x97   : > { %470 = vrot.lane.b32.xlu2 %v1667_v31, %s1281_s10 }
  0x98   : > { %468 = vrot.lane.b32.xlu1 %v1670_v32, %s1281_s10  ;;  %466 = vrot.lane.b32.xlu0 %v1499_v49, %s1281_s10 }
  0x99   : > { %v1675_v12 = vpop.permute.xlu2 %372 }
  0x9a   : > { %v1677_v27 = vpop.permute.xlu1 %350  ;;  %v347_v43 = vpop.permute.xlu0 %346 }
  0x9b   : > { %v730_v44 = vsel %vm728_vm3, %v1394_v8, %v347_v43 }
  0x9f   : > { %492 = vrot.lane.b32.xlu2 %v1403_v13, %s1282_s11 }
  0xa0   : > { %490 = vrot.lane.b32.xlu1 %v1427_v22, %s1282_s11  ;;  %488 = vrot.lane.b32.xlu0 %v1414_v16, %s1282_s11  ;;  %v733_v22 = vsel %vm728_vm3, %v1376_v0, %v353_v61  ;;  %v327_v16 = vrot.slane %v1667_v31, 2  ;;  %v210_v61 = vld [vmem:[%s1373_s7 + $0xe0] sm:$0xff]  ;;  %v211_v0 = vld [vmem:[%s1373_s7 + $0xe8] sm:$0x3] }
  0xa1   : > { %v395_v53 = vpop.permute.xlu2 %394  ;;  %v340_v23 = vrot.slane %v210_v61, 2  ;;  %v342_v63 = vrot.slane %v211_v0, 2 }
  0xa2   : > { %v359_v40 = vpop.permute.xlu1 %358  ;;  %v1688_v57 = vsel %vm745_vm2, %v730_v44, %v395_v53  ;;  %v1690_v62 = vpop.permute.xlu0 %356  ;;  %v1710_v13 = vsel %vm277_vm1, %v327_v16, %v329_v38  ;;  %v328_v9 = vsel %vm277_vm1, %v326_v51, %v327_v16 }
  0xa3   : > { %v343_v42 = vsel %vm277_vm1, %v340_v23, %v342_v63 }
  0xa7   : > { %498 = vrot.lane.b32.xlu2 %v1459_v35, %s1282_s11 }
  0xa8   : > { %496 = vrot.lane.b32.xlu1 %v1462_v36, %s1282_s11  ;;  %494 = vrot.lane.b32.xlu0 %v1424_v21, %s1282_s11  ;;  %v337_v21 = vrot.slane %v211_v0, 1  ;;  %v334_v0 = vrot.slane %v209_v56, 1 }
  0xa9   : > { %v401_v8 = vpop.permute.xlu2 %400 }
  0xaa   : > { %v365_v43 = vpop.permute.xlu1 %364  ;;  %v1704_v44 = vsel %vm745_vm2, %v733_v22, %v401_v8  ;;  %v1706_v53 = vpop.permute.xlu0 %362  ;;  %v736_v22 = vsel %vm728_vm3, %v1437_v26, %v359_v40  ;;  %v335_v8 = vrot.slane %v210_v61, 1 }
  0xab   : > { %v739_v40 = vsel %vm728_vm3, %v1471_v39, %v365_v43  ;;  %v339_v43 = vrot.slane %v209_v56, 2 }
  0xac   : > { %v338_v33 = vsel %vm215_vm0, %v335_v8, %v337_v21  ;;  %v729_v21 = vsel %vm728_vm3, %v1391_v7, %v1664_v30 }
  0xaf   : > { %614 = vrot.lane.b32.xlu2 %v210_v61, %s1283_s21 }
  0xb0   : > { %566 = vrot.lane.b32.xlu1 %v1710_v13, %s1284_s22  ;;  %518 = vrot.lane.b32.xlu0 %v1713_v29, %s1282_s11 }
  0xb1   : > { %v407_v38 = vpop.permute.xlu2 %406 }
  0xb2   : > { %v371_v36 = vpop.permute.xlu1 %370  ;;  %v1725_v35 = vsel %vm745_vm2, %v736_v22, %v407_v38  ;;  %v1727_v20 = vpop.permute.xlu0 %368 }
  0xb3   : > { %v742_v7 = vsel %vm728_vm3, %v1502_v50, %v371_v36  ;;  %v341_v36 = vsel %vm277_vm1, %v339_v43, %v340_v23 }
  0xb7   : > { %710 = vrot.lane.b32.xlu2 %v343_v42, %s1285_s24 }
  0xb8   : > { %516 = vrot.lane.b32.xlu1 %v1731_v41, %s1282_s11  ;;  %662 = vrot.lane.b32.xlu0 %v338_v33, %s1286_s25  ;;  %v336_v33 = vsel %vm215_vm0, %v334_v0, %v335_v8  ;;  %v732_v8 = vsel %vm728_vm3, %v1387_v5, %v1677_v27  ;;  %v734_v5 = vsel %vm728_vm3, %v1379_v1, %v1650_v17 }
  0xb9   : > { %v413_v61 = vpop.permute.xlu2 %412 }
  0xba   : > { %v1746_v63 = vsel %vm745_vm2, %v739_v40, %v413_v61  ;;  %v393_v42 = vpop.permute.xlu1 %392  ;;  %v375_v22 = vpop.permute.xlu0 %374  ;;  %v731_v40 = vsel %vm728_vm3, %v1382_v2, %v1662_v14 }
  0xbb   : > { %v746_v38 = vsel %vm745_vm2, %v729_v21, %v393_v42 }
  0xbf   : > { %660 = vrot.lane.b32.xlu2 %v336_v33, %s1286_s25 }
  0xc0   : > { %612 = vrot.lane.b32.xlu1 %v209_v56, %s1283_s21  ;;  %564 = vrot.lane.b32.xlu0 %v328_v9, %s1284_s22  ;;  %v735_v56 = vsel %vm728_vm3, %v1443_v28, %v1690_v62  ;;  %v737_v62 = vsel %vm728_vm3, %v1431_v24, %v1655_v18 }
  0xc1   : > { %v419_v30 = vpop.permute.xlu2 %418 }
  0xc2   : > { %v1763_v16 = vsel %vm745_vm2, %v742_v7, %v419_v30  ;;  %v399_v0 = vpop.permute.xlu1 %398  ;;  %v397_v61 = vpop.permute.xlu0 %396 }
  0xc3   : > { %v749_v51 = vsel %vm745_vm2, %v732_v8, %v399_v0  ;;  %v748_v21 = vsel %vm745_vm2, %v731_v40, %v397_v61 }
  0xc7   : > { %562 = vrot.lane.b32.xlu2 %v1634_v11, %s1284_s22 }
  0xc8   : > { %708 = vrot.lane.b32.xlu1 %v341_v36, %s1285_s24  ;;  %514 = vrot.lane.b32.xlu0 %v1546_v10, %s1282_s11 }
  0xc9   : > { %v441_v2 = vpop.permute.xlu2 %440 }
  0xca   : > { %v1780_v23 = vsel %vm762_vm4, %v746_v38, %v441_v2  ;;  %v405_v14 = vpop.permute.xlu1 %404  ;;  %v403_v27 = vpop.permute.xlu0 %402  ;;  %v738_v38 = vsel %vm728_vm3, %v1434_v25, %v1706_v53  ;;  %v741_v53 = vsel %vm728_vm3, %v1508_v52, %v1727_v20  ;;  %v743_v20 = vsel %vm728_vm3, %v1496_v48, %v1675_v12 }
  0xcb   : > { %v752_v42 = vsel %vm745_vm2, %v735_v56, %v405_v14  ;;  %v751_v33 = vsel %vm745_vm2, %v734_v5, %v403_v27 }
  0xcf   : > { %512 = vrot.lane.b32.xlu2 %v1522_v58, %s1282_s11 }
  0xd0   : > { %658 = vrot.lane.b32.xlu1 %v1713_v29, %s1286_s25  ;;  %610 = vrot.lane.b32.xlu0 %v1667_v31, %s1283_s21  ;;  %v740_v31 = vsel %vm728_vm3, %v1465_v37, %v1660_v19  ;;  %v744_v19 = vsel %vm728_vm3, %v1499_v49, %v375_v22 }
  0xd1   : > { %v447_v17 = vpop.permute.xlu2 %446 }
  0xd2   : > { %v1797_v7 = vsel %vm762_vm4, %v749_v51, %v447_v17  ;;  %v411_v30 = vpop.permute.xlu1 %410  ;;  %v409_v43 = vpop.permute.xlu0 %408 }
  0xd3   : > { %v755_v40 = vsel %vm745_vm2, %v738_v38, %v411_v30  ;;  %v754_v29 = vsel %vm745_vm2, %v737_v62, %v409_v43 }
  0xd7   : > { %608 = vrot.lane.b32.xlu2 %v1670_v32, %s1283_s21 }
  0xd8   : > { %560 = vrot.lane.b32.xlu1 %v1637_v15, %s1284_s22  ;;  %706 = vrot.lane.b32.xlu0 %v1710_v13, %s1285_s24 }
  0xd9   : > { %v453_v18 = vpop.permute.xlu2 %452 }
  0xda   : > { %v1814_v8 = vsel %vm762_vm4, %v752_v42, %v453_v18  ;;  %v417_v0 = vpop.permute.xlu1 %416  ;;  %v415_v32 = vpop.permute.xlu0 %414 }
  0xdb   : > { %v758_v61 = vsel %vm745_vm2, %v741_v53, %v417_v0  ;;  %v757_v51 = vsel %vm745_vm2, %v740_v31, %v415_v32 }
  0xdf   : > { %704 = vrot.lane.b32.xlu2 %v328_v9, %s1285_s24 }
  0xe0   : > { %510 = vrot.lane.b32.xlu1 %v1525_v59, %s1282_s11  ;;  %656 = vrot.lane.b32.xlu0 %v1731_v41, %s1286_s25 }
  0xe1   : > { %v459_v13 = vpop.permute.xlu2 %458 }
  0xe2   : > { %v1829_v36 = vsel %vm762_vm4, %v755_v40, %v459_v13  ;;  %v423_v2 = vpop.permute.xlu1 %422  ;;  %v421_v5 = vpop.permute.xlu0 %420 }
  0xe3   : > { %v1832_v9 = vsel %vm745_vm2, %v744_v19, %v423_v2  ;;  %v1835_v56 = vsel %vm745_vm2, %v743_v20, %v421_v5 }
  0xe7   : > { %654 = vrot.lane.b32.xlu2 %v1546_v10, %s1286_s25 }
  0xe8   : > { %606 = vrot.lane.b32.xlu1 %v1499_v49, %s1283_s21  ;;  %558 = vrot.lane.b32.xlu0 %v1616_v3, %s1284_s22 }
  0xe9   : > { %v465_v41 = vpop.permute.xlu2 %464 }
  0xea   : > { %v1844_v12 = vsel %vm762_vm4, %v758_v61, %v465_v41  ;;  %v445_v22 = vpop.permute.xlu1 %444  ;;  %v443_v14 = vpop.permute.xlu0 %442 }
  0xeb   : > { %v765_v27 = vsel %vm762_vm4, %v748_v21, %v445_v22  ;;  %v764_v42 = vsel %vm762_vm4, %v1688_v57, %v443_v14 }
  0xef   : > { %556 = vrot.lane.b32.xlu2 %v1619_v4, %s1284_s22 }
  0xf0   : > { %702 = vrot.lane.b32.xlu1 %v1634_v11, %s1285_s24  ;;  %508 = vrot.lane.b32.xlu0 %v1528_v60, %s1282_s11 }
  0xf1   : > { %v471_v49 = vpop.permute.xlu2 %470 }
  0xf2   : > { %v451_v10 = vpop.permute.xlu1 %450  ;;  %v449_v17 = vpop.permute.xlu0 %448  ;;  %v778_v13 = vsel %vm762_vm4, %v1832_v9, %v471_v49 }
  0xf3   : > { %v768_v62 = vsel %vm762_vm4, %v751_v33, %v451_v10  ;;  %v767_v21 = vsel %vm762_vm4, %v1704_v44, %v449_v17 }
  0xf7   : > { %506 = vrot.lane.b32.xlu2 %v1487_v45, %s1282_s11 }
  0xf8   : > { %652 = vrot.lane.b32.xlu1 %v1522_v58, %s1286_s25  ;;  %604 = vrot.lane.b32.xlu0 %v1496_v48, %s1283_s21 }
  0xf9   : > { %v493_v11 = vpop.permute.xlu2 %492 }
  0xfa   : > { %v1865_v57 = vsel %vm779_vm5, %v765_v27, %v493_v11  ;;  %v457_v38 = vpop.permute.xlu1 %456  ;;  %v455_v30 = vpop.permute.xlu0 %454 }
  0xfb   : > { %v1868_v33 = vsel %vm762_vm4, %v754_v29, %v457_v38  ;;  %v1872_v44 = vsel %vm762_vm4, %v1725_v35, %v455_v30 }
  0xff   : > { %602 = vrot.lane.b32.xlu2 %v1502_v50, %s1283_s21 }
 0x100   : > { %554 = vrot.lane.b32.xlu1 %v1622_v6, %s1284_s22  ;;  %700 = vrot.lane.b32.xlu0 %v1637_v15, %s1285_s24 }
 0x101   : > { %v499_v48 = vpop.permute.xlu2 %498 }
 0x102   : > { %v1881_v58 = vsel %vm779_vm5, %v768_v62, %v499_v48  ;;  %v463_v43 = vpop.permute.xlu1 %462  ;;  %v461_v40 = vpop.permute.xlu0 %460 }
 0x103   : > { %v1884_v29 = vsel %vm762_vm4, %v757_v51, %v463_v43  ;;  %v1888_v35 = vsel %vm762_vm4, %v1746_v63, %v461_v40 }
 0x107   : > { %698 = vrot.lane.b32.xlu2 %v1616_v3, %s1285_s24 }
 0x108   : > { %504 = vrot.lane.b32.xlu1 %v1490_v46, %s1282_s11  ;;  %650 = vrot.lane.b32.xlu0 %v1525_v59, %s1286_s25 }
 0x109   : > { %v615_v50 = vpop.permute.xlu2 %614 }
 0x10a   : > { %v469_v15 = vpop.permute.xlu1 %468  ;;  %v1896_v18 = vpop.permute.xlu0 %466 }
 0x10b   : > { %v777_v22 = vsel %vm762_vm4, %v1835_v56, %v469_v15 }
 0x10f   : > { %648 = vrot.lane.b32.xlu2 %v1528_v60, %s1286_s25 }
 0x110   : > { %600 = vrot.lane.b32.xlu1 %v1508_v52, %s1283_s21  ;;  %552 = vrot.lane.b32.xlu0 %v1597_v54, %s1284_s22 }
 0x111   : > { %v711_v3 = vpop.permute.xlu2 %710 }
 0x112   : > { %v491_v63 = vpop.permute.xlu1 %490  ;;  %v489_v31 = vpop.permute.xlu0 %488 }
 0x113   : > { %v1905_v53 = vsel %vm779_vm5, %v764_v42, %v491_v63  ;;  %v1909_v59 = vsel %vm779_vm5, %v1780_v23, %v489_v31 }
 0x117   : > { %550 = vrot.lane.b32.xlu2 %v1600_v55, %s1284_s22 }
 0x118   : > { %696 = vrot.lane.b32.xlu1 %v1619_v4, %s1285_s24  ;;  %502 = vrot.lane.b32.xlu0 %v1493_v47, %s1282_s11 }
 0x119   : > { %v661_v52 = vpop.permute.xlu2 %660 }
 0x11a   : > { %v497_v60 = vpop.permute.xlu1 %496  ;;  %v495_v0 = vpop.permute.xlu0 %494 }
 0x11b   : > { %v1918_v32 = vsel %vm779_vm5, %v767_v21, %v497_v60  ;;  %v1922_v61 = vsel %vm779_vm5, %v1797_v7, %v495_v0 }
 0x11f   : > { %500 = vrot.lane.b32.xlu2 %v1456_v34, %s1282_s11 }
 0x120   : > { %646 = vrot.lane.b32.xlu1 %v1487_v45, %s1286_s25  ;;  %598 = vrot.lane.b32.xlu0 %v1465_v37, %s1283_s21  ;;  %v2214_v45 = vld [vmem:[#allocation14_spill] sm:$0xff] }
 0x121   : > { %v563_v4 = vpop.permute.xlu2 %562 }
 0x122   : > { %v567_v23 = vpop.permute.xlu1 %566  ;;  %v519_v51 = vpop.permute.xlu0 %518 }
 0x123   : > { %v795_v20 = vsel %vm779_vm5, %v778_v13, %v519_v51 }
 0x124   : > { %v812_v7 = vsel %vm796_vm6, %v795_v20, %v567_v23 }
 0x125   : > { %v829_v2 = vsel %vm813_vm7, %v812_v7, %v615_v50 }
 0x127   : > { %596 = vrot.lane.b32.xlu2 %v1471_v39, %s1283_s21  ;;  %v2215_v39 = vld [vmem:[#allocation11_spill] sm:$0xff] }
 0x128   : > { %548 = vrot.lane.b32.xlu1 %v2214_v45, %s1284_s22  ;;  %694 = vrot.lane.b32.xlu0 %v1622_v6, %s1285_s24 }
 0x129   : > { %v513_v37 = vpop.permute.xlu2 %512 }
 0x12a   : > { %v517_v19 = vpop.permute.xlu1 %516  ;;  %v663_v5 = vpop.permute.xlu0 %662 }
 0x12b   : > { %v846_v9 = vsel %vm830_vm8, %v829_v2, %v663_v5  ;;  %v794_v42 = vsel %vm779_vm5, %v777_v22, %v517_v19  ;;  %v2222_v19 = vld [vmem:[#allocation9_spill] sm:$0xff] }
 0x12c   : > { %v863_v41 = vsel %vm847_vm9, %v846_v9, %v711_v3  ;;  %v2219_v3 = vld [vmem:[#allocation6_spill] sm:$0xff] }
 0x12d   : > { %1098 = vmatpush.xpose.msk.msra.mxu0 %vm885_vm10, %v863_v41  ;;  %1120 = vmatpush.xpose.msk.msra.mxu1 %vm885_vm10, %v863_v41 }
 0x12e   : > { %1121 = vmatpush.xpose.msk.msra.mxu2 %vm885_vm10, %v863_v41  ;;  %v2223_v41 = vld [vmem:[#allocation3_spill] sm:$0xff] }
 0x12f   : > { %546 = vrot.lane.b32.xlu2 %v2215_v39, %s1284_s22 }
 0x130   : > { %692 = vrot.lane.b32.xlu1 %v1597_v54, %s1285_s24  ;;  %644 = vrot.lane.b32.xlu0 %v1490_v46, %s1286_s25 }
 0x131   : > { %v609_v6 = vpop.permute.xlu2 %608 }
 0x132   : > { %v613_v14 = vpop.permute.xlu1 %612  ;;  %v565_v27 = vpop.permute.xlu0 %564 }
 0x133   : > { %v811_v49 = vsel %vm796_vm6, %v794_v42, %v565_v27  ;;  %v2225_v42 = vld [vmem:[#allocation4_spill] sm:$0xff] }
 0x134   : > { %v828_v10 = vsel %vm813_vm7, %v811_v49, %v613_v14 }
 0x135   : > { %v845_v17 = vsel %vm830_vm8, %v828_v10, %v661_v52 }
 0x137   : > { %690 = vrot.lane.b32.xlu2 %v1600_v55, %s1285_s24  ;;  %v776_v55 = vsel %vm762_vm4, %v1763_v16, %v1896_v18  ;;  %v2218_v18 = vld [vmem:[#allocation8_spill] sm:$0xff] }
 0x138   : > { %642 = vrot.lane.b32.xlu1 %v1493_v47, %s1286_s25  ;;  %594 = vrot.lane.b32.xlu0 %v1434_v25, %s1283_s21  ;;  %v2216_v25 = vld [vmem:[#allocation12_spill] sm:$0xff] }
 0x139   : > { %v705_v46 = vpop.permute.xlu2 %704 }
 0x13a   : > { %v709_v54 = vpop.permute.xlu1 %708  ;;  %v515_v56 = vpop.permute.xlu0 %514 }
 0x13b   : > { %v862_v62 = vsel %vm847_vm9, %v845_v17, %v709_v54  ;;  %v793_v38 = vsel %vm779_vm5, %v776_v55, %v515_v56 }
 0x13c   : > { %1099 = vmatpush.xpose.msk.msra.mxu0 %vm885_vm10, %v862_v62  ;;  %1122 = vmatpush.xpose.msk.msra.mxu1 %vm885_vm10, %v862_v62  ;;  %v810_v30 = vsel %vm796_vm6, %v793_v38, %v563_v4  ;;  %v2220_v4 = vld [vmem:[#allocation7_spill] sm:$0xff] }
 0x13d   : > { %1123 = vmatpush.xpose.msk.msra.mxu2 %vm885_vm10, %v862_v62 }
 0x13f   : > { %640 = vrot.lane.b32.xlu2 %v1456_v34, %s1286_s25 }
 0x140   : > { %592 = vrot.lane.b32.xlu1 %v1431_v24, %s1283_s21  ;;  %544 = vrot.lane.b32.xlu0 %v2216_v25, %s1284_s22  ;;  %v2217_v24 = vld [vmem:[#allocation13_spill] sm:$0xff] }
 0x141   : > { %v655_v47 = vpop.permute.xlu2 %654 }
 0x142   : > { %v659_v21 = vpop.permute.xlu1 %658  ;;  %v611_v11 = vpop.permute.xlu0 %610 }
 0x143   : > { %v827_v48 = vsel %vm813_vm7, %v810_v30, %v611_v11 }
 0x144   : > { %v844_v40 = vsel %vm830_vm8, %v827_v48, %v659_v21 }
 0x147   : > { %590 = vrot.lane.b32.xlu2 %v1437_v26, %s1283_s21  ;;  %v792_v26 = vsel %vm779_vm5, %v1844_v12, %v513_v37  ;;  %v2221_v37 = vld [vmem:[#allocation5_spill] sm:$0xff] }
 0x148   : > { %542 = vrot.lane.b32.xlu1 %v2217_v24, %s1284_s22  ;;  %688 = vrot.lane.b32.xlu0 %v2214_v45, %s1285_s24 }
 0x149   : > { %v557_v34 = vpop.permute.xlu2 %556 }
 0x14a   : > { %v561_v43 = vpop.permute.xlu1 %560  ;;  %v707_v16 = vpop.permute.xlu0 %706 }
 0x14b   : > { %v861_v50 = vsel %vm847_vm9, %v844_v40, %v707_v16  ;;  %v809_v15 = vsel %vm796_vm6, %v792_v26, %v561_v43 }
 0x14c   : > { %1100 = vmatpush.xpose.msk.msra.mxu0 %vm885_vm10, %v861_v50  ;;  %1124 = vmatpush.xpose.msk.msra.mxu1 %vm885_vm10, %v861_v50  ;;  %v826_v31 = vsel %vm813_vm7, %v809_v15, %v609_v6 }
 0x14d   : > { %1125 = vmatpush.xpose.msk.msra.mxu2 %vm885_vm10, %v861_v50 }
 0x14f   : > { %540 = vrot.lane.b32.xlu2 %v2218_v18, %s1284_s22 }
 0x150   : > { %686 = vrot.lane.b32.xlu1 %v2215_v39, %s1285_s24  ;;  %638 = vrot.lane.b32.xlu0 %v2219_v3, %s1286_s25 }
 0x151   : > { %v507_v60 = vpop.permute.xlu2 %506 }
 0x152   : > { %v511_v63 = vpop.permute.xlu1 %510  ;;  %v657_v52 = vpop.permute.xlu0 %656 }
 0x153   : > { %v843_v0 = vsel %vm830_vm8, %v826_v31, %v657_v52  ;;  %v791_v13 = vsel %vm779_vm5, %v1884_v29, %v511_v63 }
 0x154   : > { %v860_v12 = vsel %vm847_vm9, %v843_v0, %v705_v46 }
 0x155   : > { %1101 = vmatpush.xpose.msk.msra.mxu0 %vm885_vm10, %v860_v12  ;;  %1126 = vmatpush.xpose.msk.msra.mxu1 %vm885_vm10, %v860_v12 }
 0x156   : > { %1127 = vmatpush.xpose.msk.msra.mxu2 %vm885_vm10, %v860_v12 }
 0x157   : > { %684 = vrot.lane.b32.xlu2 %v2216_v25, %s1285_s24 }
 0x158   : > { %636 = vrot.lane.b32.xlu1 %v2220_v4, %s1286_s25  ;;  %588 = vrot.lane.b32.xlu0 %v1443_v28, %s1283_s21 }
 0x159   : > { %v603_v7 = vpop.permute.xlu2 %602 }
 0x15a   : > { %v607_v23 = vpop.permute.xlu1 %606  ;;  %v559_v51 = vpop.permute.xlu0 %558 }
 0x15b   : > { %v808_v20 = vsel %vm796_vm6, %v791_v13, %v559_v51 }
 0x15c   : > { %v825_v45 = vsel %vm813_vm7, %v808_v20, %v607_v23 }
 0x15d   : > { %v842_v5 = vsel %vm830_vm8, %v825_v45, %v655_v47 }
 0x15f   : > { %634 = vrot.lane.b32.xlu2 %v2221_v37, %s1286_s25 }
 0x160   : > { %586 = vrot.lane.b32.xlu1 %v1379_v1, %s1283_s21  ;;  %538 = vrot.lane.b32.xlu0 %v2222_v19, %s1284_s22  ;;  %v2224_v1 = vld [vmem:[#allocation10_spill] sm:$0xff] }
 0x161   : > { %v699_v9 = vpop.permute.xlu2 %698 }
 0x162   : > { %v703_v28 = vpop.permute.xlu1 %702  ;;  %v509_v2 = vpop.permute.xlu0 %508 }
 0x163   : > { %v859_v29 = vsel %vm847_vm9, %v842_v5, %v703_v28  ;;  %v790_v22 = vsel %vm779_vm5, %v1888_v35, %v509_v2  ;;  %v789_v35 = vsel %vm779_vm5, %v1829_v36, %v507_v60 }
 0x164   : > { %1102 = vmatpush.xpose.msk.msra.mxu0 %vm885_vm10, %v859_v29  ;;  %1128 = vmatpush.xpose.msk.msra.mxu1 %vm885_vm10, %v859_v29  ;;  %v807_v14 = vsel %vm796_vm6, %v790_v22, %v557_v34 }
 0x165   : > { %1129 = vmatpush.xpose.msk.msra.mxu2 %vm885_vm10, %v859_v29 }
 0x167   : > { %584 = vrot.lane.b32.xlu2 %v2223_v41, %s1283_s21  ;;  %s171_s21 = sand.u32 1, %s1253_s12   ;;  %s1154_s12 = smul.u32 (%p1354_p5), 6, %s1265_s15 }
 0x168   : > { %536 = vrot.lane.b32.xlu1 %v2224_v1, %s1284_s22  ;;  %682 = vrot.lane.b32.xlu0 %v2217_v24, %s1285_s24  ;;  %s1152_s22 = smul.u32 24, %s171_s21 }
 0x169   : > { %v649_v49 = vpop.permute.xlu2 %648 }
 0x16a   : > { %v653_v39 = vpop.permute.xlu1 %652  ;;  %v605_v6 = vpop.permute.xlu0 %604 }
 0x16b   : > { %v824_v27 = vsel %vm813_vm7, %v807_v14, %v605_v6 }
 0x16c   : > { %v841_v54 = vsel %vm830_vm8, %v824_v27, %v653_v39 }
 0x170   : > { %632 = vrot.lane.b32.xlu0 %v2225_v42, %s1286_s25  ;;  %680 = vrot.lane.b32.xlu1 %v2218_v18, %s1285_s24  ;;  %s173_s24 = scalar_lea.vmem [#allocation2], %s1152_s22  ;;  %s980_s25 = sadd.s32 (%p1354_p5), %s1261_s14, %s1154_s12 }
 0x171   : > { %v551_v55 = vpop.permute.xlu2 %550  ;;  %s1117_s26 = sshll.u32 (%p1354_p5), %s980_s25, 3 }
 0x172   : > { %v555_v10 = vpop.permute.xlu1 %554  ;;  %v701_v46 = vpop.permute.xlu0 %700  ;;  %s982_s30 = scalar_lea.vmem (%p1354_p5), %s2183_s3, %s1117_s26 }
 0x173   : > { %v858_v56 = vsel %vm847_vm9, %v841_v54, %v701_v46  ;;  %v806_v17 = vsel %vm796_vm6, %v789_v35, %v555_v10 }
 0x174   : > { %1103 = vmatpush.xpose.msk.msra.mxu0 %vm885_vm10, %v858_v56  ;;  %1130 = vmatpush.xpose.msk.msra.mxu1 %vm885_vm10, %v858_v56  ;;  %v823_v25 = vsel %vm813_vm7, %v806_v17, %v603_v7 }
 0x175   : > { %1131 = vmatpush.xpose.msk.msra.mxu2 %vm885_vm10, %v858_v56 }
 0x179   : > { %v501_v24 = vpop.permute.xlu2 %500 }
 0x17a   : > { %v505_v62 = vpop.permute.xlu1 %504  ;;  %v651_v47 = vpop.permute.xlu0 %650 }
 0x17b   : > { %v840_v21 = vsel %vm830_vm8, %v823_v25, %v651_v47  ;;  %v788_v36 = vsel %vm779_vm5, %v1868_v33, %v505_v62  ;;  %v1287_v47 = vmov 0  }
 0x17c   : > { %v857_v11 = vsel %vm847_vm9, %v840_v21, %v699_v9  ;;  %1222 = vset.pattern.permute.xlu1 %v1287_v47  ;;  %1221 = vset.pattern.permute.xlu0 %v1287_v47  ;;  %v867_v21 = vld [vmem:[%s2182_s2] sm:$0xff] }
 0x17d   : > { %1104 = vmatpush.xpose.msk.msra.mxu0 %vm885_vm10, %v857_v11  ;;  %1132 = vmatpush.xpose.msk.msra.mxu1 %vm885_vm10, %v857_v11 }
 0x17e   : > { %1133 = vmatpush.xpose.msk.msra.mxu2 %vm885_vm10, %v857_v11  ;;  %1220 = vset.pattern.permute.xlu2 %v1287_v47 }
 0x17f   : > { %872 = vperm.xlu2 %1220, %v867_v21  }
 0x181   : > { %v597_v26 = vpop.permute.xlu2 %596 }
 0x182   : > { %v601_v38 = vpop.permute.xlu1 %600  ;;  %v553_v30 = vpop.permute.xlu0 %552 }
 0x183   : > { %v805_v48 = vsel %vm796_vm6, %v788_v36, %v553_v30 }
 0x184   : > { %v822_v34 = vsel %vm813_vm7, %v805_v48, %v601_v38 }
 0x185   : > { %v839_v40 = vsel %vm830_vm8, %v822_v34, %v649_v49 }
 0x189   : > { %v547_v31 = vpop.permute.xlu2 %546 }
 0x18a   : > { %v697_v43 = vpop.permute.xlu1 %696  ;;  %v503_v16 = vpop.permute.xlu0 %502 }
 0x18b   : > { %v856_v50 = vsel %vm847_vm9, %v839_v40, %v697_v43  ;;  %v787_v18 = vsel %vm779_vm5, %v1872_v44, %v503_v16  ;;  %v786_v44 = vsel %vm779_vm5, %v1814_v8, %v501_v24  ;;  %v802_v8 = vsel %vm796_vm6, %v1881_v58, %v547_v31  ;;  %v864_v31 = vld [vmem:[%s2181_s1] sm:$0xff] }
 0x18c   : > { %1105 = vmatpush.xpose.msk.msra.mxu0 %vm885_vm10, %v856_v50  ;;  %1134 = vmatpush.xpose.msk.msra.mxu1 %vm885_vm10, %v856_v50  ;;  %v804_v3 = vsel %vm796_vm6, %v787_v18, %v551_v55  ;;  %v868_v55 = vld [vmem:[%s2182_s2 + $0x8] sm:$0xff] }
 0x18d   : > { %1135 = vmatpush.xpose.msk.msra.mxu2 %vm885_vm10, %v856_v50  ;;  %877 = vperm.xlu0 %1221, %v868_v55  }
 0x191   : > { %v691_v20 = vpop.permute.xlu2 %690 }
 0x192   : > { %v647_v15 = vpop.permute.xlu1 %646  ;;  %v599_v33 = vpop.permute.xlu0 %598 }
 0x193   : > { %v821_v63 = vsel %vm813_vm7, %v804_v3, %v599_v33 }
 0x194   : > { %v838_v0 = vsel %vm830_vm8, %v821_v63, %v647_v15 }
 0x199   : > { %v641_v5 = vpop.permute.xlu2 %640 }
 0x19a   : > { %v549_v52 = vpop.permute.xlu1 %548  ;;  %v695_v60 = vpop.permute.xlu0 %694 }
 0x19b   : > { %v855_v12 = vsel %vm847_vm9, %v838_v0, %v695_v60  ;;  %v803_v4 = vsel %vm796_vm6, %v786_v44, %v549_v52  ;;  %v866_v52 = vld [vmem:[%s2181_s1 + $0x10] sm:$0x3] }
 0x19c   : > { %1106 = vmatpush.xpose.msk.msra.mxu0 %vm885_vm10, %v855_v12  ;;  %1136 = vmatpush.xpose.msk.msra.mxu1 %vm885_vm10, %v855_v12  ;;  %v820_v51 = vsel %vm813_vm7, %v803_v4, %v597_v26 }
 0x19d   : > { %1137 = vmatpush.xpose.msk.msra.mxu2 %vm885_vm10, %v855_v12 }
 0x1a1   : > { %v591_v1 = vpop.permute.xlu2 %590 }
 0x1a2   : > { %v693_v23 = vpop.permute.xlu1 %692  ;;  %v645_v13 = vpop.permute.xlu0 %644 }
 0x1a3   : > { %v837_v7 = vsel %vm830_vm8, %v820_v51, %v645_v13 }
 0x1a4   : > { %v854_v45 = vsel %vm847_vm9, %v837_v7, %v693_v23 }
 0x1a5   : > { %1107 = vmatpush.xpose.msk.msra.mxu0 %vm885_vm10, %v854_v45  ;;  %1138 = vmatpush.xpose.msk.msra.mxu1 %vm885_vm10, %v854_v45 }
 0x1a6   : > { %1139 = vmatpush.xpose.msk.msra.mxu2 %vm885_vm10, %v854_v45 }
 0x1a9   : > { %v541_v49 = vpop.permute.xlu2 %540 }
 0x1aa   : > { %v643_v37 = vpop.permute.xlu1 %642  ;;  %v595_v19 = vpop.permute.xlu0 %594  ;;  %v799_v17 = vsel %vm796_vm6, %v1865_v57, %v541_v49 }
 0x1ab   : > { %v819_v28 = vsel %vm813_vm7, %v802_v8, %v595_v19 }
 0x1ac   : > { %v836_v2 = vsel %vm830_vm8, %v819_v28, %v643_v37 }
 0x1ad   : > { %v853_v29 = vsel %vm847_vm9, %v836_v2, %v691_v20 }
 0x1ae   : > { %1108 = vmatpush.xpose.msk.msra.mxu0 %vm885_vm10, %v853_v29  ;;  %1140 = vmatpush.xpose.msk.msra.mxu1 %vm885_vm10, %v853_v29 }
 0x1af   : > { %1141 = vmatpush.xpose.msk.msra.mxu2 %vm885_vm10, %v853_v29 }
 0x1b1   : > { %v685_v35 = vpop.permute.xlu2 %684 }
 0x1b2   : > { %v593_v9 = vpop.permute.xlu1 %592  ;;  %v545_v41 = vpop.permute.xlu0 %544 }
 0x1b3   : > { %v801_v58 = vsel %vm796_vm6, %v1918_v32, %v545_v41 }
 0x1b4   : > { %v818_v39 = vsel %vm813_vm7, %v801_v58, %v593_v9 }
 0x1b5   : > { %v835_v14 = vsel %vm830_vm8, %v818_v39, %v641_v5 }
 0x1b9   : > { %v635_v24 = vpop.permute.xlu2 %634 }
 0x1ba   : > { %v543_v6 = vpop.permute.xlu1 %542  ;;  %v689_v22 = vpop.permute.xlu0 %688 }
 0x1bb   : > { %v852_v27 = vsel %vm847_vm9, %v835_v14, %v689_v22  ;;  %v800_v42 = vsel %vm796_vm6, %v1922_v61, %v543_v6  ;;  %v869_v61 = vld [vmem:[%s2182_s2 + $0x10] sm:$0x3] }
 0x1bc   : > { %1109 = vmatpush.xpose.msk.msra.mxu0 %vm885_vm10, %v852_v27  ;;  %1142 = vmatpush.xpose.msk.msra.mxu1 %vm885_vm10, %v852_v27  ;;  %v817_v10 = vsel %vm813_vm7, %v800_v42, %v591_v1 }
 0x1bd   : > { %1143 = vmatpush.xpose.msk.msra.mxu2 %vm885_vm10, %v852_v27  ;;  %882 = vperm.xlu1 %1222, %v869_v61  }
 0x1c2   : > { %v687_v32 = vpop.permute.xlu1 %686  ;;  %v639_v46 = vpop.permute.xlu0 %638 }
 0x1c3   : > { %v834_v54 = vsel %vm830_vm8, %v817_v10, %v639_v46 }
 0x1c4   : > { %v851_v56 = vsel %vm847_vm9, %v834_v54, %v687_v32 }
 0x1c5   : > { %1110 = vmatpush.xpose.msk.msra.mxu0 %vm885_vm10, %v851_v56  ;;  %1144 = vmatpush.xpose.msk.msra.mxu1 %vm885_vm10, %v851_v56 }
 0x1c6   : > { %1145 = vmatpush.xpose.msk.msra.mxu2 %vm885_vm10, %v851_v56 }
 0x1ca   : > { %v637_v62 = vpop.permute.xlu1 %636  ;;  %v589_v25 = vpop.permute.xlu0 %588 }
 0x1cb   : > { %v816_v11 = vsel %vm813_vm7, %v799_v17, %v589_v25 }
 0x1cc   : > { %v833_v38 = vsel %vm830_vm8, %v816_v11, %v637_v62 }
 0x1cd   : > { %v850_v57 = vsel %vm847_vm9, %v833_v38, %v685_v35 }
 0x1ce   : > { %1111 = vmatpush.xpose.msk.msra.mxu0 %vm885_vm10, %v850_v57  ;;  %1146 = vmatpush.xpose.msk.msra.mxu1 %vm885_vm10, %v850_v57 }
 0x1cf   : > { %1147 = vmatpush.xpose.msk.msra.mxu2 %vm885_vm10, %v850_v57 }
 0x1d2   : > { %v587_v30 = vpop.permute.xlu1 %586  ;;  %v539_v36 = vpop.permute.xlu0 %538 }
 0x1d3   : > { %v798_v48 = vsel %vm796_vm6, %v1905_v53, %v539_v36  ;;  %v585_v53 = vpop.permute.xlu2 %584 }
 0x1d4   : > { %v815_v34 = vsel %vm813_vm7, %v798_v48, %v587_v30 }
 0x1d5   : > { %v832_v43 = vsel %vm830_vm8, %v815_v34, %v635_v24 }
 0x1da   : > { %v537_v16 = vpop.permute.xlu1 %536  ;;  %v683_v40 = vpop.permute.xlu0 %682 }
 0x1db   : > { %v849_v50 = vsel %vm847_vm9, %v832_v43, %v683_v40  ;;  %v797_v26 = vsel %vm796_vm6, %v1909_v59, %v537_v16  ;;  %v865_v59 = vld [vmem:[%s2181_s1 + $0x8] sm:$0xff]  ;;  %v873_v60 = vpop.permute.xlu2 %872 }
 0x1dc   : > { %1112 = vmatpush.xpose.msk.msra.mxu0 %vm885_vm10, %v849_v50  ;;  %1148 = vmatpush.xpose.msk.msra.mxu1 %vm885_vm10, %v849_v50  ;;  %v814_v15 = vsel %vm813_vm7, %v797_v26, %v585_v53 }
 0x1dd   : > { %1149 = vmatpush.xpose.msk.msra.mxu2 %vm885_vm10, %v849_v50 }
 0x1e2   : > { %v633_v33 = vpop.permute.xlu0 %632  ;;  %v681_v18 = vpop.permute.xlu1 %680 }
 0x1e3   : > { %v831_v3 = vsel %vm830_vm8, %v814_v15, %v633_v33 }
 0x1e4   : > { %v848_v63 = vsel %vm847_vm9, %v831_v3, %v681_v18 }
 0x1e5   : > { %1113 = vmatpush.xpose.msk.msra.mxu0 %vm885_vm10, %v848_v63  ;;  %1150 = vmatpush.xpose.msk.msra.mxu1 %vm885_vm10, %v848_v63 }
 0x1e6   : > { %1151 = vmatpush.xpose.msk.msra.mxu2 %vm885_vm10, %v848_v63 }
 0x1e8   : > { %1114 = vmatmul.msk.f32.vlgmr.msra.gmra.mxu0 %vm885_vm10, %v864_v31  ;;  %1115 = vmatmul.msk.f32.vlgmr.msra.gmra.mxu1 %vm885_vm10, %v865_v59 }
 0x1e9   : > { %1116 = vmatmul.msk.f32.vlgmr.msra.gmra.mxu2 %vm885_vm10, %v866_v52 }
 0x1ff   : > { %v878_v0 = vpop.permute.xlu0 %877 }
 0x22f   : > { %v883_v51 = vpop.permute.xlu1 %882 }
 0x265   : > { %v960_v12 = vpop.f32.mrf.mxu0  ;;  %v963_v44 = vpop.f32.mrf.mxu1 }
 0x266   : > { %v961_v4 = vadd.f32 %v960_v12, %v873_v60  ;;  %v964_v23 = vadd.f32 %v963_v44, %v878_v0 }
 0x268   : > { %969 = vst [vmem:[%s173_s24] sm:$0xff] %v961_v4 }
 0x269   : > { %970 = vst [vmem:[%s173_s24 + $0x8] sm:$0xff] %v964_v23 }
 0x26b   : > { %978 = sbr.rel (!%p1354_p5) target bundleno = 632 (0x278), region = 36 }
 0x26c   : > { %v966_v13 = vpop.f32.mrf.mxu2 }
 0x26d   : > { %v967_v20 = vadd.f32 %v966_v13, %v883_v51 }
 0x26f   : > { %971 = vst [vmem:[%s173_s24 + $0x10] sm:$0x3] %v967_v20  ;;  %v1015_v7 = vld [vmem:[%s173_s24] sm:$0xff] (%p1354_p5) }
 0x270   : > { %v1017_v45 = vld [vmem:[%s173_s24 + $0x8] sm:$0xff]  ;;  %1016 = vst [vmem:[%s982_s30] sm:$0xff] %v1015_v7 }
 0x271   : > { %1018 = vst [vmem:[%s982_s30 + $0x10] sm:$0xff] %v1017_v45 }
 0x276   : > { %v1019_v8 = vld [vmem:[%s173_s24 + $0x10] sm:$0xff] }
 0x277   : > { %1020 = vst [vmem:[%s982_s30 + $0x20] sm:$0xff] %v1019_v8 }
 0x278 PF: > { %s13_s18 = sadd.s32 1, %s1277_s18   ;;  %s2226_s12 = smov %s1257_s13 }
 0x279   : > { %p10_p10 = scmp.ge.s32.totalorder %s13_s18, 6   ;;  %s2227_s13 = smov %s1365_s27 }
 0x27a   : > { %s2228_s14 = smov %s1269_s16  ;;  %s2229_s15 = smov %s1273_s17 }
 0x27b   : > { %s2230_s16 = smov %s2233_s19  ;;  %s2231_s17 = smov %s2237_s20 }
 0x27c   :  { %12 = sbr.rel (!%p10_p10) target bundleno = 4 (0x4), region = 101 }

</bundles_post_ra>
